<compile_context>
chip_gen: v5e
topology: v5e:2x2
jax: 0.10.0
libtpu: 0.0.40
codegen_flags: <defaults>
</compile_context>

<pallas_src>
import math
import numpy as np
import jax
import jax.numpy as jnp
from jax.experimental import pallas as pl
from jax.experimental.pallas import tpu as pltpu


# ----------------------------------------------------------------------------
# Dense rotary matrix -- reproduces the torch module-level get_rotary_matrix
# exactly (incl. its quirks: theta uses (i-1), R[p,2i,2i] overwritten with
# -sin(m_theta), R[p,2i,2i+1] stays 0).  Used only by the pure-JAX reference.
# ----------------------------------------------------------------------------
def get_rotary_matrix(context_window, embedding_dim):
    R = np.zeros((context_window, embedding_dim, embedding_dim), dtype=np.float32)
    for position in range(context_window):
        for i in range(embedding_dim // 2):
            theta = 10000.0 ** (-2.0 * (i - 1) / embedding_dim)
            m_theta = position * theta
            R[position, 2 * i, 2 * i] = np.cos(theta)       # overwritten (as in torch)
            R[position, 2 * i, 2 * i] = -np.sin(m_theta)
            R[position, 2 * i + 1, 2 * i] = np.sin(m_theta)
            R[position, 2 * i + 1, 2 * i + 1] = np.cos(m_theta)
    return jnp.asarray(R)


def rope_elementwise_coeffs(context_window, embedding_dim):
    """Per-position coefficient rows A, B such that  v @ R[p] == v*A[p] + roll(v,-1)*B[p].

    Derived from the quirky R above:
      out[2i]   = (v[2i+1] - v[2i]) * sin(p*theta_i)   -> A[p,2i]=-sin, B[p,2i]=sin
      out[2i+1] =  v[2i+1]          * cos(p*theta_i)   -> A[p,2i+1]=cos, B[p,2i+1]=0
    """
    d = embedding_dim
    i = np.arange(d // 2)
    theta = 10000.0 ** (-2.0 * (i - 1.0) / d)                    # (d/2,)
    m_theta = np.arange(context_window)[:, None] * theta[None, :]  # (C, d/2)
    A = np.zeros((context_window, d), np.float64)
    B = np.zeros((context_window, d), np.float64)
    A[:, 0::2] = -np.sin(m_theta)
    A[:, 1::2] = np.cos(m_theta)
    B[:, 0::2] = np.sin(m_theta)                                  # odd cols stay 0
    return A.astype(np.float32), B.astype(np.float32)


# ----------------------------------------------------------------------------
# Pallas kernels
# ----------------------------------------------------------------------------
_BF16 = jnp.bfloat16
_F32 = jnp.float32


def _llama_block_kernel(x_ref, scale_ref, wqkv_ref, ra_ref, rb_ref, maskb_ref,
                        wo_ref, bo_ref, ffw_ref, ffb_ref,
                        wg_ref, bg_ref, wl_ref, bl_ref, beta_ref, o_ref):
    # One full LlamaBlock for one batch element (grid axis = batch, "parallel").
    M, D = x_ref.shape[1], x_ref.shape[2]
    HD = ra_ref.shape[1]          # n_heads * d_model
    H = HD // D
    inv_md = 1.0 / float(M * D)

    x = x_ref[0]                                             # (M, D) f32

    # ---- RMSNorm #1 (per batch element, matches torch dim=(1,2) norm) ----
    xn = scale_ref[...] * (x * jax.lax.rsqrt(jnp.sum(x * x) * inv_md))

    # ---- fused QKV (+ column-rolled copies for RoPE) : one wide matmul ----
    xb = xn.astype(_BF16)
    qkv = jnp.dot(xb, wqkv_ref[...], preferred_element_type=_F32)   # (M, 5*HD)
    ra = ra_ref[...]
    rb = rb_ref[...]
    q = qkv[:, 0 * HD:1 * HD] * ra + qkv[:, 1 * HD:2 * HD] * rb     # rotated Q (all heads)
    k = qkv[:, 2 * HD:3 * HD] * ra + qkv[:, 3 * HD:4 * HD] * rb     # rotated K (all heads)
    v = qkv[:, 4 * HD:5 * HD]

    qb = q.astype(_BF16)
    kb = k.astype(_BF16)
    vb = v.astype(_BF16)
    mask_bias = maskb_ref[...]                               # (M, M), hoisted to host
    wo = wo_ref[...]                                         # (HD, D) bf16
    scale = 1.0 / math.sqrt(D)

    # ---- per-head causal SDPA, out-projection accumulated (no concat) ----
    # TODO(synk): SDPA dropout_p=0.1 and nn.Dropout(0.1) are eval-mode identity here.
    attn = jnp.zeros((M, D), _F32)
    for h in range(H):                                       # static unroll, H is small
        sl = slice(h * D, (h + 1) * D)
        s = jax.lax.dot_general(qb[:, sl], kb[:, sl], (((1,), (1,)), ((), ())),
                                preferred_element_type=_F32) * scale + mask_bias
        m = jnp.max(s, axis=-1, keepdims=True)
        e = jnp.exp(s - m)
        p = e * pl.reciprocal(jnp.sum(e, axis=-1, keepdims=True), approx=True)
        ho = jnp.dot(p.astype(_BF16), vb[:, sl], preferred_element_type=_F32)
        attn = attn + jnp.dot(ho.astype(_BF16), wo[sl, :], preferred_element_type=_F32)

    # ---- residual + RMSNorm #2 (same shared scale as in torch) ----
    h1 = xn + attn + bo_ref[...]
    h1n = scale_ref[...] * (h1 * jax.lax.rsqrt(jnp.sum(h1 * h1) * inv_md))

    # ---- feedforward: Linear(d,d) -> SwiGLU(d), fused, + residual ----
    h1b = h1n.astype(_BF16)
    ff = jnp.dot(h1b, ffw_ref[...], preferred_element_type=_F32) + ffb_ref[...]
    fb = ff.astype(_BF16)
    g = jnp.dot(fb, wg_ref[...], preferred_element_type=_F32) + bg_ref[...]
    l = jnp.dot(fb, wl_ref[...], preferred_element_type=_F32) + bl_ref[...]
    beta = beta_ref[0, 0]
    o_ref[0] = h1n + (g * jax.nn.sigmoid(beta * g)) * l


def _ffn_head_kernel(x_ref, w1_ref, b1_ref, wg_ref, bg_ref, wl_ref, bl_ref,
                     beta_ref, w2_ref, b2_ref, o_ref):
    # Final head: Linear(d,d) -> SwiGLU(d) -> Linear(d, vocab), one batch element.
    # TODO(synk): tile the vocab dimension (lane-dense 128*k blocks) for real vocab sizes.
    x = x_ref[0]                                             # (M, D)
    xb = x.astype(_BF16)
    h = jnp.dot(xb, w1_ref[...], preferred_element_type=_F32) + b1_ref[...]
    hb = h.astype(_BF16)
    g = jnp.dot(hb, wg_ref[...], preferred_element_type=_F32) + bg_ref[...]
    l = jnp.dot(hb, wl_ref[...], preferred_element_type=_F32) + bl_ref[...]
    beta = beta_ref[0, 0]
    sw = (g * jax.nn.sigmoid(beta * g)) * l
    o_ref[0] = jnp.dot(sw.astype(_BF16), w2_ref[...],
                       preferred_element_type=_F32) + b2_ref[...]


# ----------------------------------------------------------------------------
# pallas_call wrappers (grid over batch, "parallel" -> shards across v7x TCs)
# ----------------------------------------------------------------------------
_CPAR = pltpu.CompilerParams(dimension_semantics=("parallel",))


def _rep(shape):
    n = len(shape)
    return pl.BlockSpec(shape, lambda b, _n=n: (0,) * _n)


def pallas_llama_block(x, blk, ra, rb, mask_bias):
    B, M, D = x.shape
    HD = ra.shape[1]
    in_specs = [
        pl.BlockSpec((1, M, D), lambda b: (b, 0, 0)),   # x
        _rep((M, D)),                                   # rms scale (sliced to M)
        _rep((D, 5 * HD)),                              # fused QKV(+rolled) weights
        _rep((M, HD)), _rep((M, HD)),                   # RoPE coeffs A, B
        _rep((M, M)),                                   # causal mask bias (hoisted)
        _rep((HD, D)), _rep((1, D)),                    # wo, bo
        _rep((D, D)), _rep((1, D)),                     # ff_w, ff_b
        _rep((D, D)), _rep((1, D)),                     # wg, bg
        _rep((D, D)), _rep((1, D)),                     # wl, bl
        _rep((1, 1)),                                   # beta
    ]
    return pl.pallas_call(
        _llama_block_kernel,
        grid=(B,),
        in_specs=in_specs,
        out_specs=pl.BlockSpec((1, M, D), lambda b: (b, 0, 0)),
        out_shape=jax.ShapeDtypeStruct((B, M, D), _F32),
        compiler_params=_CPAR,
    )(x, blk['rms_scale'][:M], blk['w_qkv'], ra, rb, mask_bias,
      blk['wo'], blk['bo'], blk['ff_w'], blk['ff_b'],
      blk['wg'], blk['bg'], blk['wl'], blk['bl'], blk['beta'])


def pallas_ffn_head(x, fp):
    B, M, D = x.shape
    V = fp['w2'].shape[1]
    in_specs = [pl.BlockSpec((1, M, D), lambda b: (b, 0, 0)),
                _rep((D, D)), _rep((1, D)),
                _rep((D, D)), _rep((1, D)), _rep((D, D)), _rep((1, D)), _rep((1, 1)),
                _rep((D, V)), _rep((1, V))]
    return pl.pallas_call(
        _ffn_head_kernel,
        grid=(B,),
        in_specs=in_specs,
        out_specs=pl.BlockSpec((1, M, V), lambda b: (b, 0, 0)),
        out_shape=jax.ShapeDtypeStruct((B, M, V), _F32),
        compiler_params=_CPAR,
    )(x, fp['w1'], fp['b1'], fp['wg'], fp['bg'], fp['wl'], fp['bl'], fp['beta'],
      fp['w2'], fp['b2'])


def llama_forward(idx, packed, cfg):
    B, M = idx.shape
    x = packed['emb'][idx]          # TODO(synk): embedding gather kept in XLA glue
    ra = packed['rope_a'][:M]
    rb = packed['rope_b'][:M]
    mask = packed['mask_bias'][:M, :M]
    for blk in packed['blocks']:
        x = pallas_llama_block(x, blk, ra, rb, mask)
    return pallas_ffn_head(x, packed['final'])


# ----------------------------------------------------------------------------
# Parameter init (torch-like layout, f32) + packing into the fused/bf16 layout
# ----------------------------------------------------------------------------
def init_base_params(key, cfg):
    d, H = cfg['d_model'], cfg['n_heads']
    V, C = cfg['vocab_size'], cfg['context_window']
    keys = iter(jax.random.split(key, 1024))

    def nrm(shape, s=0.02):
        return (s * jax.random.normal(next(keys), shape)).astype(_F32)

    def swiglu_params(size):
        return dict(wg=nrm((size, size)), bg=nrm((1, size)),
                    wl=nrm((size, size)), bl=nrm((1, size)),
                    beta=jnp.ones((1, 1), _F32))

    base = dict(emb=nrm((V, d)), R=get_rotary_matrix(C, d))
    blocks = []
    for _ in range(cfg['n_layers']):
        blocks.append(dict(
            rms_scale=jnp.ones((C, d), _F32),
            heads=[dict(wq=nrm((d, d)), wk=nrm((d, d)), wv=nrm((d, d)))
                   for _ in range(H)],
            wo=nrm((H * d, d)), bo=nrm((1, d)),
            ff_w=nrm((d, d)), ff_b=nrm((1, d)),
            sw=swiglu_params(d)))
    base['blocks'] = blocks
    base['ffn_w1'], base['ffn_b1'] = nrm((d, d)), nrm((1, d))
    base['ffn_sw'] = swiglu_params(d)
    base['ffn_w2'], base['ffn_b2'] = nrm((d, V)), nrm((1, V))
    return base


def pack_params(base, cfg):
    d, H, C = cfg['d_model'], cfg['n_heads'], cfg['context_window']
    A, B = rope_elementwise_coeffs(C, d)

    def bf(x):
        return jnp.asarray(x, dtype=_BF16)

    packed_blocks = []
    for blk in base['blocks']:
        wq = [np.asarray(h['wq']) for h in blk['heads']]
        wk = [np.asarray(h['wk']) for h in blk['heads']]
        wv = [np.asarray(h['wv']) for h in blk['heads']]
        wqs = [np.roll(w, -1, axis=1) for w in wq]   # column roll done on host
        wks = [np.roll(w, -1, axis=1) for w in wk]
        w_qkv = np.concatenate(wq + wqs + wk + wks + wv, axis=1)   # (d, 5*H*d)
        sw = blk['sw']
        packed_blocks.append(dict(
            rms_scale=blk['rms_scale'],
            w_qkv=bf(w_qkv),
            wo=bf(blk['wo']), bo=blk['bo'],
            ff_w=bf(blk['ff_w']), ff_b=blk['ff_b'],
            wg=bf(sw['wg']), bg=sw['bg'], wl=bf(sw['wl']), bl=sw['bl'],
            beta=sw['beta']))

    fsw = base['ffn_sw']
    final = dict(w1=bf(base['ffn_w1']), b1=base['ffn_b1'],
                 wg=bf(fsw['wg']), bg=fsw['bg'], wl=bf(fsw['wl']), bl=fsw['bl'],
                 beta=fsw['beta'],
                 w2=bf(base['ffn_w2']), b2=base['ffn_b2'])

    rows = np.arange(C)
    mask_bias = np.where(rows[:, None] >= rows[None, :], 0.0, -1e30).astype(np.float32)

    return dict(
        emb=base['emb'],
        rope_a=jnp.asarray(np.tile(A, (1, H))),   # (C, H*d)
        rope_b=jnp.asarray(np.tile(B, (1, H))),
        mask_bias=jnp.asarray(mask_bias),
        blocks=packed_blocks,
        final=final)


# ----------------------------------------------------------------------------
# Pure-JAX f32 reference (mirrors the torch module exactly, dense R matrices)
# ----------------------------------------------------------------------------
def _ref_rmsnorm(x, scale):
    Bb, M, D = x.shape
    ff_rms = jnp.sqrt(jnp.sum(x * x, axis=(1, 2))) * float(M * D) ** (-0.5)
    return scale[None, :M, :] * (x / ff_rms[:, None, None])


def _ref_swiglu(x, sw):
    g = x @ sw['wg'] + sw['bg']
    l = x @ sw['wl'] + sw['bl']
    return (g * jax.nn.sigmoid(sw['beta'][0, 0] * g)) * l


def _ref_attention(x, blk, R):
    Bb, M, D = x.shape
    row = np.arange(M)
    allowed = (row[None, :] <= row[:, None])[None]           # (1, M, M) causal
    outs = []
    for h in blk['heads']:
        q, k, v = x @ h['wq'], x @ h['wk'], x @ h['wv']
        qr = jnp.einsum('bpd,pde->bpe', q, R[:M])
        kr = jnp.einsum('bpd,pde->bpe', k, R[:M])
        s = jnp.einsum('bqe,bke->bqk', qr, kr) / math.sqrt(D)
        s = jnp.where(allowed, s, -jnp.inf)
        p = jax.nn.softmax(s, axis=-1)
        outs.append(jnp.einsum('bqk,bkd->bqd', p, v))
    cat = jnp.concatenate(outs, axis=-1)
    return cat @ blk['wo'] + blk['bo']


def ref_forward(idx, base, cfg):
    x = base['emb'][idx]
    for blk in base['blocks']:
        x = _ref_rmsnorm(x, blk['rms_scale'])
        x = x + _ref_attention(x, blk, base['R'])
        x = _ref_rmsnorm(x, blk['rms_scale'])
        ff = x @ blk['ff_w'] + blk['ff_b']
        x = x + _ref_swiglu(ff, blk['sw'])
    h = x @ base['ffn_w1'] + base['ffn_b1']
    h = _ref_swiglu(h, base['ffn_sw'])
    return h @ base['ffn_w2'] + base['ffn_b2']


# ----------------------------------------------------------------------------
if __name__ == "__main__":
    cfg = dict(vocab_size=64, d_model=32, context_window=8, n_heads=2, n_layers=2)
    pkey, ikey = jax.random.split(jax.random.PRNGKey(0))
    base = init_base_params(pkey, cfg)
    packed = pack_params(base, cfg)
    idx = jax.random.randint(ikey, (2, cfg['context_window']), 0,
                             cfg['vocab_size'], dtype=jnp.int32)

    fwd = jax.jit(lambda i: llama_forward(i, packed, cfg))
    logits = fwd(idx)
    jax.block_until_ready(logits)

    assert logits.shape == (2, cfg['context_window'], cfg['vocab_size'])
    assert bool(jnp.all(jnp.isfinite(logits)))

    # Tolerance-check the fused bf16 kernels against an f32 pure-JAX reference.
    with jax.default_matmul_precision('float32'):
        ref = ref_forward(idx, base, cfg)
    ref = jax.block_until_ready(ref)
    np.testing.assert_allclose(np.asarray(logits), np.asarray(ref),
                               rtol=2e-2, atol=2e-3)

    print("KERNEL_OK")
</pallas_src>

<mosaic_0001>
module attributes {stable_mosaic.version = 11 : i64} {
  func.func @_ffn_head_kernel(%arg0: i32, %arg1: memref<1x8x32xf32, #tpu.memory_space<vmem>>, %arg2: memref<32x32xbf16, #tpu.memory_space<vmem>>, %arg3: memref<1x32xf32, #tpu.memory_space<vmem>>, %arg4: memref<32x32xbf16, #tpu.memory_space<vmem>>, %arg5: memref<1x32xf32, #tpu.memory_space<vmem>>, %arg6: memref<32x32xbf16, #tpu.memory_space<vmem>>, %arg7: memref<1x32xf32, #tpu.memory_space<vmem>>, %arg8: memref<1x1xf32, #tpu.memory_space<vmem>>, %arg9: memref<32x64xbf16, #tpu.memory_space<vmem>>, %arg10: memref<1x64xf32, #tpu.memory_space<vmem>>, %arg11: memref<1x8x64xf32, #tpu.memory_space<vmem>>) attributes {dimension_semantics = [#tpu.dimension_semantics<parallel>], iteration_bounds = array<i64: 2>, scalar_prefetch = 0 : i64, scratch_operands = 0 : i64, tpu.core_type = #tpu.core_type<tc>, window_params = [{transform_indices = @transform_0, window_bounds = array<i64: 1, 8, 32>}, {pipeline_mode = #tpu.pipeline_mode<synchronous>, transform_indices = @transform_1, window_bounds = array<i64: 32, 32>}, {pipeline_mode = #tpu.pipeline_mode<synchronous>, transform_indices = @transform_2, window_bounds = array<i64: 1, 32>}, {pipeline_mode = #tpu.pipeline_mode<synchronous>, transform_indices = @transform_3, window_bounds = array<i64: 32, 32>}, {pipeline_mode = #tpu.pipeline_mode<synchronous>, transform_indices = @transform_4, window_bounds = array<i64: 1, 32>}, {pipeline_mode = #tpu.pipeline_mode<synchronous>, transform_indices = @transform_5, window_bounds = array<i64: 32, 32>}, {pipeline_mode = #tpu.pipeline_mode<synchronous>, transform_indices = @transform_6, window_bounds = array<i64: 1, 32>}, {pipeline_mode = #tpu.pipeline_mode<synchronous>, transform_indices = @transform_7, window_bounds = array<i64: 1, 1>}, {pipeline_mode = #tpu.pipeline_mode<synchronous>, transform_indices = @transform_8, window_bounds = array<i64: 32, 64>}, {pipeline_mode = #tpu.pipeline_mode<synchronous>, transform_indices = @transform_9, window_bounds = array<i64: 1, 64>}, {transform_indices = @transform_10, window_bounds = array<i64: 1, 8, 64>}]} {
    %c0 = arith.constant 0 : index
    %c0_0 = arith.constant 0 : index
    %c0_1 = arith.constant 0 : index
    %0 = vector.load %arg1[%c0, %c0_0, %c0_1] : memref<1x8x32xf32, #tpu.memory_space<vmem>>, vector<1x8x32xf32>
    %1 = vector.shape_cast %0 : vector<1x8x32xf32> to vector<8x32xf32>
    %2 = arith.truncf %1 : vector<8x32xf32> to vector<8x32xbf16>
    %c0_2 = arith.constant 0 : index
    %c0_3 = arith.constant 0 : index
    %3 = vector.load %arg2[%c0_2, %c0_3] : memref<32x32xbf16, #tpu.memory_space<vmem>>, vector<32x32xbf16>
    %cst = arith.constant dense<0.000000e+00> : vector<8x32xf32>
    %4 = tpu.matmul %2, %3, %cst {dimension_numbers = #tpu.dot_dimension_numbers<[1], [0], [0], [1], [0, 0, 1, 1], [], []>} : vector<8x32xbf16>, vector<32x32xbf16>, vector<8x32xf32> -> vector<8x32xf32>
    %c0_4 = arith.constant 0 : index
    %c0_5 = arith.constant 0 : index
    %5 = vector.load %arg3[%c0_4, %c0_5] : memref<1x32xf32, #tpu.memory_space<vmem>>, vector<1x32xf32>
    %6 = vector.broadcast %5 : vector<1x32xf32> to vector<8x32xf32>
    %7 = arith.addf %4, %6 : vector<8x32xf32>
    %8 = arith.truncf %7 : vector<8x32xf32> to vector<8x32xbf16>
    %c0_6 = arith.constant 0 : index
    %c0_7 = arith.constant 0 : index
    %9 = vector.load %arg4[%c0_6, %c0_7] : memref<32x32xbf16, #tpu.memory_space<vmem>>, vector<32x32xbf16>
    %cst_8 = arith.constant dense<0.000000e+00> : vector<8x32xf32>
    %10 = tpu.matmul %8, %9, %cst_8 {dimension_numbers = #tpu.dot_dimension_numbers<[1], [0], [0], [1], [0, 0, 1, 1], [], []>} : vector<8x32xbf16>, vector<32x32xbf16>, vector<8x32xf32> -> vector<8x32xf32>
    %c0_9 = arith.constant 0 : index
    %c0_10 = arith.constant 0 : index
    %11 = vector.load %arg5[%c0_9, %c0_10] : memref<1x32xf32, #tpu.memory_space<vmem>>, vector<1x32xf32>
    %12 = vector.broadcast %11 : vector<1x32xf32> to vector<8x32xf32>
    %13 = arith.addf %10, %12 : vector<8x32xf32>
    %c0_11 = arith.constant 0 : index
    %c0_12 = arith.constant 0 : index
    %14 = vector.load %arg6[%c0_11, %c0_12] : memref<32x32xbf16, #tpu.memory_space<vmem>>, vector<32x32xbf16>
    %cst_13 = arith.constant dense<0.000000e+00> : vector<8x32xf32>
    %15 = tpu.matmul %8, %14, %cst_13 {dimension_numbers = #tpu.dot_dimension_numbers<[1], [0], [0], [1], [0, 0, 1, 1], [], []>} : vector<8x32xbf16>, vector<32x32xbf16>, vector<8x32xf32> -> vector<8x32xf32>
    %c0_14 = arith.constant 0 : index
    %c0_15 = arith.constant 0 : index
    %16 = vector.load %arg7[%c0_14, %c0_15] : memref<1x32xf32, #tpu.memory_space<vmem>>, vector<1x32xf32>
    %17 = vector.broadcast %16 : vector<1x32xf32> to vector<8x32xf32>
    %18 = arith.addf %15, %17 : vector<8x32xf32>
    %c0_16 = arith.constant 0 : index
    %c0_17 = arith.constant 0 : index
    %19 = vector.load %arg8[%c0_16, %c0_17] : memref<1x1xf32, #tpu.memory_space<vmem>>, vector<1x1xf32>
    %20 = vector.extract %19[0, 0] : f32 from vector<1x1xf32>
    %21 = vector.broadcast %20 : f32 to vector<8x32xf32>
    %22 = arith.mulf %21, %13 : vector<8x32xf32>
    %23 = arith.negf %22 : vector<8x32xf32>
    %24 = math.exp %23 : vector<8x32xf32>
    %cst_18 = arith.constant 1.000000e+00 : f32
    %25 = vector.broadcast %cst_18 : f32 to vector<8x32xf32>
    %26 = arith.addf %25, %24 : vector<8x32xf32>
    %27 = arith.divf %25, %26 : vector<8x32xf32>
    %28 = arith.mulf %13, %27 : vector<8x32xf32>
    %29 = arith.mulf %28, %18 : vector<8x32xf32>
    %30 = arith.truncf %29 : vector<8x32xf32> to vector<8x32xbf16>
    %c0_19 = arith.constant 0 : index
    %c0_20 = arith.constant 0 : index
    %31 = vector.load %arg9[%c0_19, %c0_20] : memref<32x64xbf16, #tpu.memory_space<vmem>>, vector<32x64xbf16>
    %cst_21 = arith.constant dense<0.000000e+00> : vector<8x64xf32>
    %32 = tpu.matmul %30, %31, %cst_21 {dimension_numbers = #tpu.dot_dimension_numbers<[1], [0], [0], [1], [0, 0, 1, 1], [], []>} : vector<8x32xbf16>, vector<32x64xbf16>, vector<8x64xf32> -> vector<8x64xf32>
    %c0_22 = arith.constant 0 : index
    %c0_23 = arith.constant 0 : index
    %33 = vector.load %arg10[%c0_22, %c0_23] : memref<1x64xf32, #tpu.memory_space<vmem>>, vector<1x64xf32>
    %34 = vector.broadcast %33 : vector<1x64xf32> to vector<8x64xf32>
    %35 = arith.addf %32, %34 : vector<8x64xf32>
    %c0_24 = arith.constant 0 : index
    %c0_25 = arith.constant 0 : index
    %c0_26 = arith.constant 0 : index
    %36 = vector.load %arg11[%c0_24, %c0_25, %c0_26] : memref<1x8x64xf32, #tpu.memory_space<vmem>>, vector<1x8x64xf32>
    %37 = vector.shape_cast %36 : vector<1x8x64xf32> to vector<8x64xf32>
    %38 = vector.shape_cast %35 : vector<8x64xf32> to vector<1x8x64xf32>
    tpu.vector_store %arg11[%c0_24, %c0_25, %c0_26], %38 {strides = array<i32>} : memref<1x8x64xf32, #tpu.memory_space<vmem>>, vector<1x8x64xf32>,
    return
  }
  func.func @transform_0(%arg0: i32) -> (i32, i32, i32) {
    %c0_i32 = arith.constant 0 : i32
    %c0_i32_0 = arith.constant 0 : i32
    %c0_i32_1 = arith.constant 0 : i32
    return %arg0, %c0_i32, %c0_i32_0 : i32, i32, i32
  }
  func.func @transform_1(%arg0: i32) -> (i32, i32) {
    %c0_i32 = arith.constant 0 : i32
    %c0_i32_0 = arith.constant 0 : i32
    %c0_i32_1 = arith.constant 0 : i32
    return %c0_i32, %c0_i32_0 : i32, i32
  }
  func.func @transform_2(%arg0: i32) -> (i32, i32) {
    %c0_i32 = arith.constant 0 : i32
    %c0_i32_0 = arith.constant 0 : i32
    %c0_i32_1 = arith.constant 0 : i32
    return %c0_i32, %c0_i32_0 : i32, i32
  }
  func.func @transform_3(%arg0: i32) -> (i32, i32) {
    %c0_i32 = arith.constant 0 : i32
    %c0_i32_0 = arith.constant 0 : i32
    %c0_i32_1 = arith.constant 0 : i32
    return %c0_i32, %c0_i32_0 : i32, i32
  }
  func.func @transform_4(%arg0: i32) -> (i32, i32) {
    %c0_i32 = arith.constant 0 : i32
    %c0_i32_0 = arith.constant 0 : i32
    %c0_i32_1 = arith.constant 0 : i32
    return %c0_i32, %c0_i32_0 : i32, i32
  }
  func.func @transform_5(%arg0: i32) -> (i32, i32) {
    %c0_i32 = arith.constant 0 : i32
    %c0_i32_0 = arith.constant 0 : i32
    %c0_i32_1 = arith.constant 0 : i32
    return %c0_i32, %c0_i32_0 : i32, i32
  }
  func.func @transform_6(%arg0: i32) -> (i32, i32) {
    %c0_i32 = arith.constant 0 : i32
    %c0_i32_0 = arith.constant 0 : i32
    %c0_i32_1 = arith.constant 0 : i32
    return %c0_i32, %c0_i32_0 : i32, i32
  }
  func.func @transform_7(%arg0: i32) -> (i32, i32) {
    %c0_i32 = arith.constant 0 : i32
    %c0_i32_0 = arith.constant 0 : i32
    %c0_i32_1 = arith.constant 0 : i32
    return %c0_i32, %c0_i32_0 : i32, i32
  }
  func.func @transform_8(%arg0: i32) -> (i32, i32) {
    %c0_i32 = arith.constant 0 : i32
    %c0_i32_0 = arith.constant 0 : i32
    %c0_i32_1 = arith.constant 0 : i32
    return %c0_i32, %c0_i32_0 : i32, i32
  }
  func.func @transform_9(%arg0: i32) -> (i32, i32) {
    %c0_i32 = arith.constant 0 : i32
    %c0_i32_0 = arith.constant 0 : i32
    %c0_i32_1 = arith.constant 0 : i32
    return %c0_i32, %c0_i32_0 : i32, i32
  }
  func.func @transform_10(%arg0: i32) -> (i32, i32, i32) {
    %c0_i32 = arith.constant 0 : i32
    %c0_i32_0 = arith.constant 0 : i32
    %c0_i32_1 = arith.constant 0 : i32
    return %arg0, %c0_i32, %c0_i32_0 : i32, i32, i32
  }
}

module attributes {stable_mosaic.version = 11 : i64} {
  func.func @_llama_block_kernel(%arg0: i32, %arg1: memref<1x8x32xf32, #tpu.memory_space<vmem>>, %arg2: memref<8x32xf32, #tpu.memory_space<vmem>>, %arg3: memref<32x320xbf16, #tpu.memory_space<vmem>>, %arg4: memref<8x64xf32, #tpu.memory_space<vmem>>, %arg5: memref<8x64xf32, #tpu.memory_space<vmem>>, %arg6: memref<8x8xf32, #tpu.memory_space<vmem>>, %arg7: memref<64x32xbf16, #tpu.memory_space<vmem>>, %arg8: memref<1x32xf32, #tpu.memory_space<vmem>>, %arg9: memref<32x32xbf16, #tpu.memory_space<vmem>>, %arg10: memref<1x32xf32, #tpu.memory_space<vmem>>, %arg11: memref<32x32xbf16, #tpu.memory_space<vmem>>, %arg12: memref<1x32xf32, #tpu.memory_space<vmem>>, %arg13: memref<32x32xbf16, #tpu.memory_space<vmem>>, %arg14: memref<1x32xf32, #tpu.memory_space<vmem>>, %arg15: memref<1x1xf32, #tpu.memory_space<vmem>>, %arg16: memref<1x8x32xf32, #tpu.memory_space<vmem>>) attributes {dimension_semantics = [#tpu.dimension_semantics<parallel>], iteration_bounds = array<i64: 2>, scalar_prefetch = 0 : i64, scratch_operands = 0 : i64, tpu.core_type = #tpu.core_type<tc>, window_params = [{transform_indices = @transform_0, window_bounds = array<i64: 1, 8, 32>}, {pipeline_mode = #tpu.pipeline_mode<synchronous>, transform_indices = @transform_1, window_bounds = array<i64: 8, 32>}, {pipeline_mode = #tpu.pipeline_mode<synchronous>, transform_indices = @transform_2, window_bounds = array<i64: 32, 320>}, {pipeline_mode = #tpu.pipeline_mode<synchronous>, transform_indices = @transform_3, window_bounds = array<i64: 8, 64>}, {pipeline_mode = #tpu.pipeline_mode<synchronous>, transform_indices = @transform_4, window_bounds = array<i64: 8, 64>}, {pipeline_mode = #tpu.pipeline_mode<synchronous>, transform_indices = @transform_5, window_bounds = array<i64: 8, 8>}, {pipeline_mode = #tpu.pipeline_mode<synchronous>, transform_indices = @transform_6, window_bounds = array<i64: 64, 32>}, {pipeline_mode = #tpu.pipeline_mode<synchronous>, transform_indices = @transform_7, window_bounds = array<i64: 1, 32>}, {pipeline_mode = #tpu.pipeline_mode<synchronous>, transform_indices = @transform_8, window_bounds = array<i64: 32, 32>}, {pipeline_mode = #tpu.pipeline_mode<synchronous>, transform_indices = @transform_9, window_bounds = array<i64: 1, 32>}, {pipeline_mode = #tpu.pipeline_mode<synchronous>, transform_indices = @transform_10, window_bounds = array<i64: 32, 32>}, {pipeline_mode = #tpu.pipeline_mode<synchronous>, transform_indices = @transform_11, window_bounds = array<i64: 1, 32>}, {pipeline_mode = #tpu.pipeline_mode<synchronous>, transform_indices = @transform_12, window_bounds = array<i64: 32, 32>}, {pipeline_mode = #tpu.pipeline_mode<synchronous>, transform_indices = @transform_13, window_bounds = array<i64: 1, 32>}, {pipeline_mode = #tpu.pipeline_mode<synchronous>, transform_indices = @transform_14, window_bounds = array<i64: 1, 1>}, {transform_indices = @transform_15, window_bounds = array<i64: 1, 8, 32>}]} {
    %c0 = arith.constant 0 : index
    %c0_0 = arith.constant 0 : index
    %c0_1 = arith.constant 0 : index
    %0 = vector.load %arg1[%c0, %c0_0, %c0_1] : memref<1x8x32xf32, #tpu.memory_space<vmem>>, vector<1x8x32xf32>
    %1 = vector.shape_cast %0 : vector<1x8x32xf32> to vector<8x32xf32>
    %c0_2 = arith.constant 0 : index
    %c0_3 = arith.constant 0 : index
    %2 = vector.load %arg2[%c0_2, %c0_3] : memref<8x32xf32, #tpu.memory_space<vmem>>, vector<8x32xf32>
    %3 = arith.mulf %1, %1 : vector<8x32xf32>
    %4 = vector.shape_cast %3 : vector<8x32xf32> to vector<1x8x32xf32>
    %cst = arith.constant dense<0.000000e+00> : vector<1xf32>
    %5 = vector.multi_reduction <add>, %4, %cst [1, 2] : vector<1x8x32xf32> to vector<1xf32>
    %6 = vector.shape_cast %5 : vector<1xf32> to vector<1x1x1xf32>
    %7 = vector.extract %6[0, 0, 0] : f32 from vector<1x1x1xf32>
    %cst_4 = arith.constant 3.906250e-03 : f32
    %8 = arith.mulf %7, %cst_4 : f32
    %9 = math.rsqrt %8 : f32
    %10 = vector.broadcast %9 : f32 to vector<8x32xf32>
    %11 = arith.mulf %1, %10 : vector<8x32xf32>
    %12 = arith.mulf %2, %11 : vector<8x32xf32>
    %13 = arith.truncf %12 : vector<8x32xf32> to vector<8x32xbf16>
    %c0_5 = arith.constant 0 : index
    %c0_6 = arith.constant 0 : index
    %14 = vector.load %arg3[%c0_5, %c0_6] : memref<32x320xbf16, #tpu.memory_space<vmem>>, vector<32x320xbf16>
    %cst_7 = arith.constant dense<0.000000e+00> : vector<8x320xf32>
    %15 = tpu.matmul %13, %14, %cst_7 {dimension_numbers = #tpu.dot_dimension_numbers<[1], [0], [0], [1], [0, 0, 1, 1], [], []>} : vector<8x32xbf16>, vector<32x320xbf16>, vector<8x320xf32> -> vector<8x320xf32>
    %c0_8 = arith.constant 0 : index
    %c0_9 = arith.constant 0 : index
    %16 = vector.load %arg4[%c0_8, %c0_9] : memref<8x64xf32, #tpu.memory_space<vmem>>, vector<8x64xf32>
    %c0_10 = arith.constant 0 : index
    %c0_11 = arith.constant 0 : index
    %17 = vector.load %arg5[%c0_10, %c0_11] : memref<8x64xf32, #tpu.memory_space<vmem>>, vector<8x64xf32>
    %18 = vector.extract_strided_slice %15 {offsets = [0, 0], sizes = [8, 64], strides = [1, 1]} : vector<8x320xf32> to vector<8x64xf32>
    %19 = arith.mulf %18, %16 : vector<8x64xf32>
    %20 = vector.extract_strided_slice %15 {offsets = [0, 64], sizes = [8, 64], strides = [1, 1]} : vector<8x320xf32> to vector<8x64xf32>
    %21 = arith.mulf %20, %17 : vector<8x64xf32>
    %22 = arith.addf %19, %21 : vector<8x64xf32>
    %23 = vector.extract_strided_slice %15 {offsets = [0, 128], sizes = [8, 64], strides = [1, 1]} : vector<8x320xf32> to vector<8x64xf32>
    %24 = arith.mulf %23, %16 : vector<8x64xf32>
    %25 = vector.extract_strided_slice %15 {offsets = [0, 192], sizes = [8, 64], strides = [1, 1]} : vector<8x320xf32> to vector<8x64xf32>
    %26 = arith.mulf %25, %17 : vector<8x64xf32>
    %27 = arith.addf %24, %26 : vector<8x64xf32>
    %28 = vector.extract_strided_slice %15 {offsets = [0, 256], sizes = [8, 64], strides = [1, 1]} : vector<8x320xf32> to vector<8x64xf32>
    %29 = arith.truncf %22 : vector<8x64xf32> to vector<8x64xbf16>
    %30 = arith.truncf %27 : vector<8x64xf32> to vector<8x64xbf16>
    %31 = arith.truncf %28 : vector<8x64xf32> to vector<8x64xbf16>
    %c0_12 = arith.constant 0 : index
    %c0_13 = arith.constant 0 : index
    %32 = vector.load %arg6[%c0_12, %c0_13] : memref<8x8xf32, #tpu.memory_space<vmem>>, vector<8x8xf32>
    %c0_14 = arith.constant 0 : index
    %c0_15 = arith.constant 0 : index
    %33 = vector.load %arg7[%c0_14, %c0_15] : memref<64x32xbf16, #tpu.memory_space<vmem>>, vector<64x32xbf16>
    %cst_16 = arith.constant 0.000000e+00 : f32
    %34 = vector.broadcast %cst_16 : f32 to vector<8x32xf32>
    %35 = vector.extract_strided_slice %29 {offsets = [0, 0], sizes = [8, 32], strides = [1, 1]} : vector<8x64xbf16> to vector<8x32xbf16>
    %36 = vector.extract_strided_slice %30 {offsets = [0, 0], sizes = [8, 32], strides = [1, 1]} : vector<8x64xbf16> to vector<8x32xbf16>
    %cst_17 = arith.constant dense<0.000000e+00> : vector<8x8xf32>
    %37 = tpu.matmul %35, %36, %cst_17 {dimension_numbers = #tpu.dot_dimension_numbers<[1], [1], [0], [0], [0, 0, 1, 0], [], []>} : vector<8x32xbf16>, vector<8x32xbf16>, vector<8x8xf32> -> vector<8x8xf32>
    %cst_18 = arith.constant 0.176776692 : f32
    %38 = vector.broadcast %cst_18 : f32 to vector<8x8xf32>
    %39 = arith.mulf %37, %38 : vector<8x8xf32>
    %40 = arith.addf %39, %32 : vector<8x8xf32>
    %cst_19 = arith.constant dense<0xFF800000> : vector<8xf32>
    %41 = vector.multi_reduction <maximumf>, %40, %cst_19 [1] : vector<8x8xf32> to vector<8xf32>
    %42 = vector.shape_cast %41 : vector<8xf32> to vector<8x1xf32>
    %43 = vector.broadcast %42 : vector<8x1xf32> to vector<8x8xf32>
    %44 = arith.subf %40, %43 : vector<8x8xf32>
    %45 = math.exp %44 : vector<8x8xf32>
    %cst_20 = arith.constant dense<0.000000e+00> : vector<8xf32>
    %46 = vector.multi_reduction <add>, %45, %cst_20 [1] : vector<8x8xf32> to vector<8xf32>
    %47 = vector.shape_cast %46 : vector<8xf32> to vector<8x1xf32>
    %48 = tpu.reciprocal %47 {approx = true} : vector<8x1xf32> -> vector<8x1xf32>
    %49 = vector.broadcast %48 : vector<8x1xf32> to vector<8x8xf32>
    %50 = arith.mulf %45, %49 : vector<8x8xf32>
    %51 = arith.truncf %50 : vector<8x8xf32> to vector<8x8xbf16>
    %52 = vector.extract_strided_slice %31 {offsets = [0, 0], sizes = [8, 32], strides = [1, 1]} : vector<8x64xbf16> to vector<8x32xbf16>
    %cst_21 = arith.constant dense<0.000000e+00> : vector<8x32xf32>
    %53 = tpu.matmul %51, %52, %cst_21 {dimension_numbers = #tpu.dot_dimension_numbers<[1], [0], [0], [1], [0, 0, 1, 1], [], []>} : vector<8x8xbf16>, vector<8x32xbf16>, vector<8x32xf32> -> vector<8x32xf32>
    %54 = arith.truncf %53 : vector<8x32xf32> to vector<8x32xbf16>
    %55 = vector.extract_strided_slice %33 {offsets = [0, 0], sizes = [32, 32], strides = [1, 1]} : vector<64x32xbf16> to vector<32x32xbf16>
    %cst_22 = arith.constant dense<0.000000e+00> : vector<8x32xf32>
    %56 = tpu.matmul %54, %55, %cst_22 {dimension_numbers = #tpu.dot_dimension_numbers<[1], [0], [0], [1], [0, 0, 1, 1], [], []>} : vector<8x32xbf16>, vector<32x32xbf16>, vector<8x32xf32> -> vector<8x32xf32>
    %57 = arith.addf %34, %56 : vector<8x32xf32>
    %58 = vector.extract_strided_slice %29 {offsets = [0, 32], sizes = [8, 32], strides = [1, 1]} : vector<8x64xbf16> to vector<8x32xbf16>
    %59 = vector.extract_strided_slice %30 {offsets = [0, 32], sizes = [8, 32], strides = [1, 1]} : vector<8x64xbf16> to vector<8x32xbf16>
    %cst_23 = arith.constant dense<0.000000e+00> : vector<8x8xf32>
    %60 = tpu.matmul %58, %59, %cst_23 {dimension_numbers = #tpu.dot_dimension_numbers<[1], [1], [0], [0], [0, 0, 1, 0], [], []>} : vector<8x32xbf16>, vector<8x32xbf16>, vector<8x8xf32> -> vector<8x8xf32>
    %cst_24 = arith.constant 0.176776692 : f32
    %61 = vector.broadcast %cst_24 : f32 to vector<8x8xf32>
    %62 = arith.mulf %60, %61 : vector<8x8xf32>
    %63 = arith.addf %62, %32 : vector<8x8xf32>
    %cst_25 = arith.constant dense<0xFF800000> : vector<8xf32>
    %64 = vector.multi_reduction <maximumf>, %63, %cst_25 [1] : vector<8x8xf32> to vector<8xf32>
    %65 = vector.shape_cast %64 : vector<8xf32> to vector<8x1xf32>
    %66 = vector.broadcast %65 : vector<8x1xf32> to vector<8x8xf32>
    %67 = arith.subf %63, %66 : vector<8x8xf32>
    %68 = math.exp %67 : vector<8x8xf32>
    %cst_26 = arith.constant dense<0.000000e+00> : vector<8xf32>
    %69 = vector.multi_reduction <add>, %68, %cst_26 [1] : vector<8x8xf32> to vector<8xf32>
    %70 = vector.shape_cast %69 : vector<8xf32> to vector<8x1xf32>
    %71 = tpu.reciprocal %70 {approx = true} : vector<8x1xf32> -> vector<8x1xf32>
    %72 = vector.broadcast %71 : vector<8x1xf32> to vector<8x8xf32>
    %73 = arith.mulf %68, %72 : vector<8x8xf32>
    %74 = arith.truncf %73 : vector<8x8xf32> to vector<8x8xbf16>
    %75 = vector.extract_strided_slice %31 {offsets = [0, 32], sizes = [8, 32], strides = [1, 1]} : vector<8x64xbf16> to vector<8x32xbf16>
    %cst_27 = arith.constant dense<0.000000e+00> : vector<8x32xf32>
    %76 = tpu.matmul %74, %75, %cst_27 {dimension_numbers = #tpu.dot_dimension_numbers<[1], [0], [0], [1], [0, 0, 1, 1], [], []>} : vector<8x8xbf16>, vector<8x32xbf16>, vector<8x32xf32> -> vector<8x32xf32>
    %77 = arith.truncf %76 : vector<8x32xf32> to vector<8x32xbf16>
    %78 = vector.extract_strided_slice %33 {offsets = [32, 0], sizes = [32, 32], strides = [1, 1]} : vector<64x32xbf16> to vector<32x32xbf16>
    %cst_28 = arith.constant dense<0.000000e+00> : vector<8x32xf32>
    %79 = tpu.matmul %77, %78, %cst_28 {dimension_numbers = #tpu.dot_dimension_numbers<[1], [0], [0], [1], [0, 0, 1, 1], [], []>} : vector<8x32xbf16>, vector<32x32xbf16>, vector<8x32xf32> -> vector<8x32xf32>
    %80 = arith.addf %57, %79 : vector<8x32xf32>
    %81 = arith.addf %12, %80 : vector<8x32xf32>
    %c0_29 = arith.constant 0 : index
    %c0_30 = arith.constant 0 : index
    %82 = vector.load %arg8[%c0_29, %c0_30] : memref<1x32xf32, #tpu.memory_space<vmem>>, vector<1x32xf32>
    %83 = vector.broadcast %82 : vector<1x32xf32> to vector<8x32xf32>
    %84 = arith.addf %81, %83 : vector<8x32xf32>
    %c0_31 = arith.constant 0 : index
    %c0_32 = arith.constant 0 : index
    %85 = vector.load %arg2[%c0_31, %c0_32] : memref<8x32xf32, #tpu.memory_space<vmem>>, vector<8x32xf32>
    %86 = arith.mulf %84, %84 : vector<8x32xf32>
    %87 = vector.shape_cast %86 : vector<8x32xf32> to vector<1x8x32xf32>
    %cst_33 = arith.constant dense<0.000000e+00> : vector<1xf32>
    %88 = vector.multi_reduction <add>, %87, %cst_33 [1, 2] : vector<1x8x32xf32> to vector<1xf32>
    %89 = vector.shape_cast %88 : vector<1xf32> to vector<1x1x1xf32>
    %90 = vector.extract %89[0, 0, 0] : f32 from vector<1x1x1xf32>
    %cst_34 = arith.constant 3.906250e-03 : f32
    %91 = arith.mulf %90, %cst_34 : f32
    %92 = math.rsqrt %91 : f32
    %93 = vector.broadcast %92 : f32 to vector<8x32xf32>
    %94 = arith.mulf %84, %93 : vector<8x32xf32>
    %95 = arith.mulf %85, %94 : vector<8x32xf32>
    %96 = arith.truncf %95 : vector<8x32xf32> to vector<8x32xbf16>
    %c0_35 = arith.constant 0 : index
    %c0_36 = arith.constant 0 : index
    %97 = vector.load %arg9[%c0_35, %c0_36] : memref<32x32xbf16, #tpu.memory_space<vmem>>, vector<32x32xbf16>
    %cst_37 = arith.constant dense<0.000000e+00> : vector<8x32xf32>
    %98 = tpu.matmul %96, %97, %cst_37 {dimension_numbers = #tpu.dot_dimension_numbers<[1], [0], [0], [1], [0, 0, 1, 1], [], []>} : vector<8x32xbf16>, vector<32x32xbf16>, vector<8x32xf32> -> vector<8x32xf32>
    %c0_38 = arith.constant 0 : index
    %c0_39 = arith.constant 0 : index
    %99 = vector.load %arg10[%c0_38, %c0_39] : memref<1x32xf32, #tpu.memory_space<vmem>>, vector<1x32xf32>
    %100 = vector.broadcast %99 : vector<1x32xf32> to vector<8x32xf32>
    %101 = arith.addf %98, %100 : vector<8x32xf32>
    %102 = arith.truncf %101 : vector<8x32xf32> to vector<8x32xbf16>
    %c0_40 = arith.constant 0 : index
    %c0_41 = arith.constant 0 : index
    %103 = vector.load %arg11[%c0_40, %c0_41] : memref<32x32xbf16, #tpu.memory_space<vmem>>, vector<32x32xbf16>
    %cst_42 = arith.constant dense<0.000000e+00> : vector<8x32xf32>
    %104 = tpu.matmul %102, %103, %cst_42 {dimension_numbers = #tpu.dot_dimension_numbers<[1], [0], [0], [1], [0, 0, 1, 1], [], []>} : vector<8x32xbf16>, vector<32x32xbf16>, vector<8x32xf32> -> vector<8x32xf32>
    %c0_43 = arith.constant 0 : index
    %c0_44 = arith.constant 0 : index
    %105 = vector.load %arg12[%c0_43, %c0_44] : memref<1x32xf32, #tpu.memory_space<vmem>>, vector<1x32xf32>
    %106 = vector.broadcast %105 : vector<1x32xf32> to vector<8x32xf32>
    %107 = arith.addf %104, %106 : vector<8x32xf32>
    %c0_45 = arith.constant 0 : index
    %c0_46 = arith.constant 0 : index
    %108 = vector.load %arg13[%c0_45, %c0_46] : memref<32x32xbf16, #tpu.memory_space<vmem>>, vector<32x32xbf16>
    %cst_47 = arith.constant dense<0.000000e+00> : vector<8x32xf32>
    %109 = tpu.matmul %102, %108, %cst_47 {dimension_numbers = #tpu.dot_dimension_numbers<[1], [0], [0], [1], [0, 0, 1, 1], [], []>} : vector<8x32xbf16>, vector<32x32xbf16>, vector<8x32xf32> -> vector<8x32xf32>
    %c0_48 = arith.constant 0 : index
    %c0_49 = arith.constant 0 : index
    %110 = vector.load %arg14[%c0_48, %c0_49] : memref<1x32xf32, #tpu.memory_space<vmem>>, vector<1x32xf32>
    %111 = vector.broadcast %110 : vector<1x32xf32> to vector<8x32xf32>
    %112 = arith.addf %109, %111 : vector<8x32xf32>
    %c0_50 = arith.constant 0 : index
    %c0_51 = arith.constant 0 : index
    %113 = vector.load %arg15[%c0_50, %c0_51] : memref<1x1xf32, #tpu.memory_space<vmem>>, vector<1x1xf32>
    %114 = vector.extract %113[0, 0] : f32 from vector<1x1xf32>
    %115 = vector.broadcast %114 : f32 to vector<8x32xf32>
    %116 = arith.mulf %115, %107 : vector<8x32xf32>
    %117 = arith.negf %116 : vector<8x32xf32>
    %118 = math.exp %117 : vector<8x32xf32>
    %cst_52 = arith.constant 1.000000e+00 : f32
    %119 = vector.broadcast %cst_52 : f32 to vector<8x32xf32>
    %120 = arith.addf %119, %118 : vector<8x32xf32>
    %121 = arith.divf %119, %120 : vector<8x32xf32>
    %122 = arith.mulf %107, %121 : vector<8x32xf32>
    %123 = arith.mulf %122, %112 : vector<8x32xf32>
    %124 = arith.addf %95, %123 : vector<8x32xf32>
    %c0_53 = arith.constant 0 : index
    %c0_54 = arith.constant 0 : index
    %c0_55 = arith.constant 0 : index
    %125 = vector.load %arg16[%c0_53, %c0_54, %c0_55] : memref<1x8x32xf32, #tpu.memory_space<vmem>>, vector<1x8x32xf32>
    %126 = vector.shape_cast %125 : vector<1x8x32xf32> to vector<8x32xf32>
    %127 = vector.shape_cast %124 : vector<8x32xf32> to vector<1x8x32xf32>
    tpu.vector_store %arg16[%c0_53, %c0_54, %c0_55], %127 {strides = array<i32>} : memref<1x8x32xf32, #tpu.memory_space<vmem>>, vector<1x8x32xf32>,
    return
  }
  func.func @transform_0(%arg0: i32) -> (i32, i32, i32) {
    %c0_i32 = arith.constant 0 : i32
    %c0_i32_0 = arith.constant 0 : i32
    %c0_i32_1 = arith.constant 0 : i32
    return %arg0, %c0_i32, %c0_i32_0 : i32, i32, i32
  }
  func.func @transform_1(%arg0: i32) -> (i32, i32) {
    %c0_i32 = arith.constant 0 : i32
    %c0_i32_0 = arith.constant 0 : i32
    %c0_i32_1 = arith.constant 0 : i32
    return %c0_i32, %c0_i32_0 : i32, i32
  }
  func.func @transform_2(%arg0: i32) -> (i32, i32) {
    %c0_i32 = arith.constant 0 : i32
    %c0_i32_0 = arith.constant 0 : i32
    %c0_i32_1 = arith.constant 0 : i32
    return %c0_i32, %c0_i32_0 : i32, i32
  }
  func.func @transform_3(%arg0: i32) -> (i32, i32) {
    %c0_i32 = arith.constant 0 : i32
    %c0_i32_0 = arith.constant 0 : i32
    %c0_i32_1 = arith.constant 0 : i32
    return %c0_i32, %c0_i32_0 : i32, i32
  }
  func.func @transform_4(%arg0: i32) -> (i32, i32) {
    %c0_i32 = arith.constant 0 : i32
    %c0_i32_0 = arith.constant 0 : i32
    %c0_i32_1 = arith.constant 0 : i32
    return %c0_i32, %c0_i32_0 : i32, i32
  }
  func.func @transform_5(%arg0: i32) -> (i32, i32) {
    %c0_i32 = arith.constant 0 : i32
    %c0_i32_0 = arith.constant 0 : i32
    %c0_i32_1 = arith.constant 0 : i32
    return %c0_i32, %c0_i32_0 : i32, i32
  }
  func.func @transform_6(%arg0: i32) -> (i32, i32) {
    %c0_i32 = arith.constant 0 : i32
    %c0_i32_0 = arith.constant 0 : i32
    %c0_i32_1 = arith.constant 0 : i32
    return %c0_i32, %c0_i32_0 : i32, i32
  }
  func.func @transform_7(%arg0: i32) -> (i32, i32) {
    %c0_i32 = arith.constant 0 : i32
    %c0_i32_0 = arith.constant 0 : i32
    %c0_i32_1 = arith.constant 0 : i32
    return %c0_i32, %c0_i32_0 : i32, i32
  }
  func.func @transform_8(%arg0: i32) -> (i32, i32) {
    %c0_i32 = arith.constant 0 : i32
    %c0_i32_0 = arith.constant 0 : i32
    %c0_i32_1 = arith.constant 0 : i32
    return %c0_i32, %c0_i32_0 : i32, i32
  }
  func.func @transform_9(%arg0: i32) -> (i32, i32) {
    %c0_i32 = arith.constant 0 : i32
    %c0_i32_0 = arith.constant 0 : i32
    %c0_i32_1 = arith.constant 0 : i32
    return %c0_i32, %c0_i32_0 : i32, i32
  }
  func.func @transform_10(%arg0: i32) -> (i32, i32) {
    %c0_i32 = arith.constant 0 : i32
    %c0_i32_0 = arith.constant 0 : i32
    %c0_i32_1 = arith.constant 0 : i32
    return %c0_i32, %c0_i32_0 : i32, i32
  }
  func.func @transform_11(%arg0: i32) -> (i32, i32) {
    %c0_i32 = arith.constant 0 : i32
    %c0_i32_0 = arith.constant 0 : i32
    %c0_i32_1 = arith.constant 0 : i32
    return %c0_i32, %c0_i32_0 : i32, i32
  }
  func.func @transform_12(%arg0: i32) -> (i32, i32) {
    %c0_i32 = arith.constant 0 : i32
    %c0_i32_0 = arith.constant 0 : i32
    %c0_i32_1 = arith.constant 0 : i32
    return %c0_i32, %c0_i32_0 : i32, i32
  }
  func.func @transform_13(%arg0: i32) -> (i32, i32) {
    %c0_i32 = arith.constant 0 : i32
    %c0_i32_0 = arith.constant 0 : i32
    %c0_i32_1 = arith.constant 0 : i32
    return %c0_i32, %c0_i32_0 : i32, i32
  }
  func.func @transform_14(%arg0: i32) -> (i32, i32) {
    %c0_i32 = arith.constant 0 : i32
    %c0_i32_0 = arith.constant 0 : i32
    %c0_i32_1 = arith.constant 0 : i32
    return %c0_i32, %c0_i32_0 : i32, i32
  }
  func.func @transform_15(%arg0: i32) -> (i32, i32, i32) {
    %c0_i32 = arith.constant 0 : i32
    %c0_i32_0 = arith.constant 0 : i32
    %c0_i32_1 = arith.constant 0 : i32
    return %arg0, %c0_i32, %c0_i32_0 : i32, i32, i32
  }
}

module attributes {stable_mosaic.version = 11 : i64} {
  func.func @_llama_block_kernel(%arg0: i32, %arg1: memref<1x8x32xf32, #tpu.memory_space<vmem>>, %arg2: memref<8x32xf32, #tpu.memory_space<vmem>>, %arg3: memref<32x320xbf16, #tpu.memory_space<vmem>>, %arg4: memref<8x64xf32, #tpu.memory_space<vmem>>, %arg5: memref<8x64xf32, #tpu.memory_space<vmem>>, %arg6: memref<8x8xf32, #tpu.memory_space<vmem>>, %arg7: memref<64x32xbf16, #tpu.memory_space<vmem>>, %arg8: memref<1x32xf32, #tpu.memory_space<vmem>>, %arg9: memref<32x32xbf16, #tpu.memory_space<vmem>>, %arg10: memref<1x32xf32, #tpu.memory_space<vmem>>, %arg11: memref<32x32xbf16, #tpu.memory_space<vmem>>, %arg12: memref<1x32xf32, #tpu.memory_space<vmem>>, %arg13: memref<32x32xbf16, #tpu.memory_space<vmem>>, %arg14: memref<1x32xf32, #tpu.memory_space<vmem>>, %arg15: memref<1x1xf32, #tpu.memory_space<vmem>>, %arg16: memref<1x8x32xf32, #tpu.memory_space<vmem>>) attributes {dimension_semantics = [#tpu.dimension_semantics<parallel>], iteration_bounds = array<i64: 2>, scalar_prefetch = 0 : i64, scratch_operands = 0 : i64, tpu.core_type = #tpu.core_type<tc>, window_params = [{transform_indices = @transform_0, window_bounds = array<i64: 1, 8, 32>}, {pipeline_mode = #tpu.pipeline_mode<synchronous>, transform_indices = @transform_1, window_bounds = array<i64: 8, 32>}, {pipeline_mode = #tpu.pipeline_mode<synchronous>, transform_indices = @transform_2, window_bounds = array<i64: 32, 320>}, {pipeline_mode = #tpu.pipeline_mode<synchronous>, transform_indices = @transform_3, window_bounds = array<i64: 8, 64>}, {pipeline_mode = #tpu.pipeline_mode<synchronous>, transform_indices = @transform_4, window_bounds = array<i64: 8, 64>}, {pipeline_mode = #tpu.pipeline_mode<synchronous>, transform_indices = @transform_5, window_bounds = array<i64: 8, 8>}, {pipeline_mode = #tpu.pipeline_mode<synchronous>, transform_indices = @transform_6, window_bounds = array<i64: 64, 32>}, {pipeline_mode = #tpu.pipeline_mode<synchronous>, transform_indices = @transform_7, window_bounds = array<i64: 1, 32>}, {pipeline_mode = #tpu.pipeline_mode<synchronous>, transform_indices = @transform_8, window_bounds = array<i64: 32, 32>}, {pipeline_mode = #tpu.pipeline_mode<synchronous>, transform_indices = @transform_9, window_bounds = array<i64: 1, 32>}, {pipeline_mode = #tpu.pipeline_mode<synchronous>, transform_indices = @transform_10, window_bounds = array<i64: 32, 32>}, {pipeline_mode = #tpu.pipeline_mode<synchronous>, transform_indices = @transform_11, window_bounds = array<i64: 1, 32>}, {pipeline_mode = #tpu.pipeline_mode<synchronous>, transform_indices = @transform_12, window_bounds = array<i64: 32, 32>}, {pipeline_mode = #tpu.pipeline_mode<synchronous>, transform_indices = @transform_13, window_bounds = array<i64: 1, 32>}, {pipeline_mode = #tpu.pipeline_mode<synchronous>, transform_indices = @transform_14, window_bounds = array<i64: 1, 1>}, {transform_indices = @transform_15, window_bounds = array<i64: 1, 8, 32>}]} {
    %c0 = arith.constant 0 : index
    %c0_0 = arith.constant 0 : index
    %c0_1 = arith.constant 0 : index
    %0 = vector.load %arg1[%c0, %c0_0, %c0_1] : memref<1x8x32xf32, #tpu.memory_space<vmem>>, vector<1x8x32xf32>
    %1 = vector.shape_cast %0 : vector<1x8x32xf32> to vector<8x32xf32>
    %c0_2 = arith.constant 0 : index
    %c0_3 = arith.constant 0 : index
    %2 = vector.load %arg2[%c0_2, %c0_3] : memref<8x32xf32, #tpu.memory_space<vmem>>, vector<8x32xf32>
    %3 = arith.mulf %1, %1 : vector<8x32xf32>
    %4 = vector.shape_cast %3 : vector<8x32xf32> to vector<1x8x32xf32>
    %cst = arith.constant dense<0.000000e+00> : vector<1xf32>
    %5 = vector.multi_reduction <add>, %4, %cst [1, 2] : vector<1x8x32xf32> to vector<1xf32>
    %6 = vector.shape_cast %5 : vector<1xf32> to vector<1x1x1xf32>
    %7 = vector.extract %6[0, 0, 0] : f32 from vector<1x1x1xf32>
    %cst_4 = arith.constant 3.906250e-03 : f32
    %8 = arith.mulf %7, %cst_4 : f32
    %9 = math.rsqrt %8 : f32
    %10 = vector.broadcast %9 : f32 to vector<8x32xf32>
    %11 = arith.mulf %1, %10 : vector<8x32xf32>
    %12 = arith.mulf %2, %11 : vector<8x32xf32>
    %13 = arith.truncf %12 : vector<8x32xf32> to vector<8x32xbf16>
    %c0_5 = arith.constant 0 : index
    %c0_6 = arith.constant 0 : index
    %14 = vector.load %arg3[%c0_5, %c0_6] : memref<32x320xbf16, #tpu.memory_space<vmem>>, vector<32x320xbf16>
    %cst_7 = arith.constant dense<0.000000e+00> : vector<8x320xf32>
    %15 = tpu.matmul %13, %14, %cst_7 {dimension_numbers = #tpu.dot_dimension_numbers<[1], [0], [0], [1], [0, 0, 1, 1], [], []>} : vector<8x32xbf16>, vector<32x320xbf16>, vector<8x320xf32> -> vector<8x320xf32>
    %c0_8 = arith.constant 0 : index
    %c0_9 = arith.constant 0 : index
    %16 = vector.load %arg4[%c0_8, %c0_9] : memref<8x64xf32, #tpu.memory_space<vmem>>, vector<8x64xf32>
    %c0_10 = arith.constant 0 : index
    %c0_11 = arith.constant 0 : index
    %17 = vector.load %arg5[%c0_10, %c0_11] : memref<8x64xf32, #tpu.memory_space<vmem>>, vector<8x64xf32>
    %18 = vector.extract_strided_slice %15 {offsets = [0, 0], sizes = [8, 64], strides = [1, 1]} : vector<8x320xf32> to vector<8x64xf32>
    %19 = arith.mulf %18, %16 : vector<8x64xf32>
    %20 = vector.extract_strided_slice %15 {offsets = [0, 64], sizes = [8, 64], strides = [1, 1]} : vector<8x320xf32> to vector<8x64xf32>
    %21 = arith.mulf %20, %17 : vector<8x64xf32>
    %22 = arith.addf %19, %21 : vector<8x64xf32>
    %23 = vector.extract_strided_slice %15 {offsets = [0, 128], sizes = [8, 64], strides = [1, 1]} : vector<8x320xf32> to vector<8x64xf32>
    %24 = arith.mulf %23, %16 : vector<8x64xf32>
    %25 = vector.extract_strided_slice %15 {offsets = [0, 192], sizes = [8, 64], strides = [1, 1]} : vector<8x320xf32> to vector<8x64xf32>
    %26 = arith.mulf %25, %17 : vector<8x64xf32>
    %27 = arith.addf %24, %26 : vector<8x64xf32>
    %28 = vector.extract_strided_slice %15 {offsets = [0, 256], sizes = [8, 64], strides = [1, 1]} : vector<8x320xf32> to vector<8x64xf32>
    %29 = arith.truncf %22 : vector<8x64xf32> to vector<8x64xbf16>
    %30 = arith.truncf %27 : vector<8x64xf32> to vector<8x64xbf16>
    %31 = arith.truncf %28 : vector<8x64xf32> to vector<8x64xbf16>
    %c0_12 = arith.constant 0 : index
    %c0_13 = arith.constant 0 : index
    %32 = vector.load %arg6[%c0_12, %c0_13] : memref<8x8xf32, #tpu.memory_space<vmem>>, vector<8x8xf32>
    %c0_14 = arith.constant 0 : index
    %c0_15 = arith.constant 0 : index
    %33 = vector.load %arg7[%c0_14, %c0_15] : memref<64x32xbf16, #tpu.memory_space<vmem>>, vector<64x32xbf16>
    %cst_16 = arith.constant 0.000000e+00 : f32
    %34 = vector.broadcast %cst_16 : f32 to vector<8x32xf32>
    %35 = vector.extract_strided_slice %29 {offsets = [0, 0], sizes = [8, 32], strides = [1, 1]} : vector<8x64xbf16> to vector<8x32xbf16>
    %36 = vector.extract_strided_slice %30 {offsets = [0, 0], sizes = [8, 32], strides = [1, 1]} : vector<8x64xbf16> to vector<8x32xbf16>
    %cst_17 = arith.constant dense<0.000000e+00> : vector<8x8xf32>
    %37 = tpu.matmul %35, %36, %cst_17 {dimension_numbers = #tpu.dot_dimension_numbers<[1], [1], [0], [0], [0, 0, 1, 0], [], []>} : vector<8x32xbf16>, vector<8x32xbf16>, vector<8x8xf32> -> vector<8x8xf32>
    %cst_18 = arith.constant 0.176776692 : f32
    %38 = vector.broadcast %cst_18 : f32 to vector<8x8xf32>
    %39 = arith.mulf %37, %38 : vector<8x8xf32>
    %40 = arith.addf %39, %32 : vector<8x8xf32>
    %cst_19 = arith.constant dense<0xFF800000> : vector<8xf32>
    %41 = vector.multi_reduction <maximumf>, %40, %cst_19 [1] : vector<8x8xf32> to vector<8xf32>
    %42 = vector.shape_cast %41 : vector<8xf32> to vector<8x1xf32>
    %43 = vector.broadcast %42 : vector<8x1xf32> to vector<8x8xf32>
    %44 = arith.subf %40, %43 : vector<8x8xf32>
    %45 = math.exp %44 : vector<8x8xf32>
    %cst_20 = arith.constant dense<0.000000e+00> : vector<8xf32>
    %46 = vector.multi_reduction <add>, %45, %cst_20 [1] : vector<8x8xf32> to vector<8xf32>
    %47 = vector.shape_cast %46 : vector<8xf32> to vector<8x1xf32>
    %48 = tpu.reciprocal %47 {approx = true} : vector<8x1xf32> -> vector<8x1xf32>
    %49 = vector.broadcast %48 : vector<8x1xf32> to vector<8x8xf32>
    %50 = arith.mulf %45, %49 : vector<8x8xf32>
    %51 = arith.truncf %50 : vector<8x8xf32> to vector<8x8xbf16>
    %52 = vector.extract_strided_slice %31 {offsets = [0, 0], sizes = [8, 32], strides = [1, 1]} : vector<8x64xbf16> to vector<8x32xbf16>
    %cst_21 = arith.constant dense<0.000000e+00> : vector<8x32xf32>
    %53 = tpu.matmul %51, %52, %cst_21 {dimension_numbers = #tpu.dot_dimension_numbers<[1], [0], [0], [1], [0, 0, 1, 1], [], []>} : vector<8x8xbf16>, vector<8x32xbf16>, vector<8x32xf32> -> vector<8x32xf32>
    %54 = arith.truncf %53 : vector<8x32xf32> to vector<8x32xbf16>
    %55 = vector.extract_strided_slice %33 {offsets = [0, 0], sizes = [32, 32], strides = [1, 1]} : vector<64x32xbf16> to vector<32x32xbf16>
    %cst_22 = arith.constant dense<0.000000e+00> : vector<8x32xf32>
    %56 = tpu.matmul %54, %55, %cst_22 {dimension_numbers = #tpu.dot_dimension_numbers<[1], [0], [0], [1], [0, 0, 1, 1], [], []>} : vector<8x32xbf16>, vector<32x32xbf16>, vector<8x32xf32> -> vector<8x32xf32>
    %57 = arith.addf %34, %56 : vector<8x32xf32>
    %58 = vector.extract_strided_slice %29 {offsets = [0, 32], sizes = [8, 32], strides = [1, 1]} : vector<8x64xbf16> to vector<8x32xbf16>
    %59 = vector.extract_strided_slice %30 {offsets = [0, 32], sizes = [8, 32], strides = [1, 1]} : vector<8x64xbf16> to vector<8x32xbf16>
    %cst_23 = arith.constant dense<0.000000e+00> : vector<8x8xf32>
    %60 = tpu.matmul %58, %59, %cst_23 {dimension_numbers = #tpu.dot_dimension_numbers<[1], [1], [0], [0], [0, 0, 1, 0], [], []>} : vector<8x32xbf16>, vector<8x32xbf16>, vector<8x8xf32> -> vector<8x8xf32>
    %cst_24 = arith.constant 0.176776692 : f32
    %61 = vector.broadcast %cst_24 : f32 to vector<8x8xf32>
    %62 = arith.mulf %60, %61 : vector<8x8xf32>
    %63 = arith.addf %62, %32 : vector<8x8xf32>
    %cst_25 = arith.constant dense<0xFF800000> : vector<8xf32>
    %64 = vector.multi_reduction <maximumf>, %63, %cst_25 [1] : vector<8x8xf32> to vector<8xf32>
    %65 = vector.shape_cast %64 : vector<8xf32> to vector<8x1xf32>
    %66 = vector.broadcast %65 : vector<8x1xf32> to vector<8x8xf32>
    %67 = arith.subf %63, %66 : vector<8x8xf32>
    %68 = math.exp %67 : vector<8x8xf32>
    %cst_26 = arith.constant dense<0.000000e+00> : vector<8xf32>
    %69 = vector.multi_reduction <add>, %68, %cst_26 [1] : vector<8x8xf32> to vector<8xf32>
    %70 = vector.shape_cast %69 : vector<8xf32> to vector<8x1xf32>
    %71 = tpu.reciprocal %70 {approx = true} : vector<8x1xf32> -> vector<8x1xf32>
    %72 = vector.broadcast %71 : vector<8x1xf32> to vector<8x8xf32>
    %73 = arith.mulf %68, %72 : vector<8x8xf32>
    %74 = arith.truncf %73 : vector<8x8xf32> to vector<8x8xbf16>
    %75 = vector.extract_strided_slice %31 {offsets = [0, 32], sizes = [8, 32], strides = [1, 1]} : vector<8x64xbf16> to vector<8x32xbf16>
    %cst_27 = arith.constant dense<0.000000e+00> : vector<8x32xf32>
    %76 = tpu.matmul %74, %75, %cst_27 {dimension_numbers = #tpu.dot_dimension_numbers<[1], [0], [0], [1], [0, 0, 1, 1], [], []>} : vector<8x8xbf16>, vector<8x32xbf16>, vector<8x32xf32> -> vector<8x32xf32>
    %77 = arith.truncf %76 : vector<8x32xf32> to vector<8x32xbf16>
    %78 = vector.extract_strided_slice %33 {offsets = [32, 0], sizes = [32, 32], strides = [1, 1]} : vector<64x32xbf16> to vector<32x32xbf16>
    %cst_28 = arith.constant dense<0.000000e+00> : vector<8x32xf32>
    %79 = tpu.matmul %77, %78, %cst_28 {dimension_numbers = #tpu.dot_dimension_numbers<[1], [0], [0], [1], [0, 0, 1, 1], [], []>} : vector<8x32xbf16>, vector<32x32xbf16>, vector<8x32xf32> -> vector<8x32xf32>
    %80 = arith.addf %57, %79 : vector<8x32xf32>
    %81 = arith.addf %12, %80 : vector<8x32xf32>
    %c0_29 = arith.constant 0 : index
    %c0_30 = arith.constant 0 : index
    %82 = vector.load %arg8[%c0_29, %c0_30] : memref<1x32xf32, #tpu.memory_space<vmem>>, vector<1x32xf32>
    %83 = vector.broadcast %82 : vector<1x32xf32> to vector<8x32xf32>
    %84 = arith.addf %81, %83 : vector<8x32xf32>
    %c0_31 = arith.constant 0 : index
    %c0_32 = arith.constant 0 : index
    %85 = vector.load %arg2[%c0_31, %c0_32] : memref<8x32xf32, #tpu.memory_space<vmem>>, vector<8x32xf32>
    %86 = arith.mulf %84, %84 : vector<8x32xf32>
    %87 = vector.shape_cast %86 : vector<8x32xf32> to vector<1x8x32xf32>
    %cst_33 = arith.constant dense<0.000000e+00> : vector<1xf32>
    %88 = vector.multi_reduction <add>, %87, %cst_33 [1, 2] : vector<1x8x32xf32> to vector<1xf32>
    %89 = vector.shape_cast %88 : vector<1xf32> to vector<1x1x1xf32>
    %90 = vector.extract %89[0, 0, 0] : f32 from vector<1x1x1xf32>
    %cst_34 = arith.constant 3.906250e-03 : f32
    %91 = arith.mulf %90, %cst_34 : f32
    %92 = math.rsqrt %91 : f32
    %93 = vector.broadcast %92 : f32 to vector<8x32xf32>
    %94 = arith.mulf %84, %93 : vector<8x32xf32>
    %95 = arith.mulf %85, %94 : vector<8x32xf32>
    %96 = arith.truncf %95 : vector<8x32xf32> to vector<8x32xbf16>
    %c0_35 = arith.constant 0 : index
    %c0_36 = arith.constant 0 : index
    %97 = vector.load %arg9[%c0_35, %c0_36] : memref<32x32xbf16, #tpu.memory_space<vmem>>, vector<32x32xbf16>
    %cst_37 = arith.constant dense<0.000000e+00> : vector<8x32xf32>
    %98 = tpu.matmul %96, %97, %cst_37 {dimension_numbers = #tpu.dot_dimension_numbers<[1], [0], [0], [1], [0, 0, 1, 1], [], []>} : vector<8x32xbf16>, vector<32x32xbf16>, vector<8x32xf32> -> vector<8x32xf32>
    %c0_38 = arith.constant 0 : index
    %c0_39 = arith.constant 0 : index
    %99 = vector.load %arg10[%c0_38, %c0_39] : memref<1x32xf32, #tpu.memory_space<vmem>>, vector<1x32xf32>
    %100 = vector.broadcast %99 : vector<1x32xf32> to vector<8x32xf32>
    %101 = arith.addf %98, %100 : vector<8x32xf32>
    %102 = arith.truncf %101 : vector<8x32xf32> to vector<8x32xbf16>
    %c0_40 = arith.constant 0 : index
    %c0_41 = arith.constant 0 : index
    %103 = vector.load %arg11[%c0_40, %c0_41] : memref<32x32xbf16, #tpu.memory_space<vmem>>, vector<32x32xbf16>
    %cst_42 = arith.constant dense<0.000000e+00> : vector<8x32xf32>
    %104 = tpu.matmul %102, %103, %cst_42 {dimension_numbers = #tpu.dot_dimension_numbers<[1], [0], [0], [1], [0, 0, 1, 1], [], []>} : vector<8x32xbf16>, vector<32x32xbf16>, vector<8x32xf32> -> vector<8x32xf32>
    %c0_43 = arith.constant 0 : index
    %c0_44 = arith.constant 0 : index
    %105 = vector.load %arg12[%c0_43, %c0_44] : memref<1x32xf32, #tpu.memory_space<vmem>>, vector<1x32xf32>
    %106 = vector.broadcast %105 : vector<1x32xf32> to vector<8x32xf32>
    %107 = arith.addf %104, %106 : vector<8x32xf32>
    %c0_45 = arith.constant 0 : index
    %c0_46 = arith.constant 0 : index
    %108 = vector.load %arg13[%c0_45, %c0_46] : memref<32x32xbf16, #tpu.memory_space<vmem>>, vector<32x32xbf16>
    %cst_47 = arith.constant dense<0.000000e+00> : vector<8x32xf32>
    %109 = tpu.matmul %102, %108, %cst_47 {dimension_numbers = #tpu.dot_dimension_numbers<[1], [0], [0], [1], [0, 0, 1, 1], [], []>} : vector<8x32xbf16>, vector<32x32xbf16>, vector<8x32xf32> -> vector<8x32xf32>
    %c0_48 = arith.constant 0 : index
    %c0_49 = arith.constant 0 : index
    %110 = vector.load %arg14[%c0_48, %c0_49] : memref<1x32xf32, #tpu.memory_space<vmem>>, vector<1x32xf32>
    %111 = vector.broadcast %110 : vector<1x32xf32> to vector<8x32xf32>
    %112 = arith.addf %109, %111 : vector<8x32xf32>
    %c0_50 = arith.constant 0 : index
    %c0_51 = arith.constant 0 : index
    %113 = vector.load %arg15[%c0_50, %c0_51] : memref<1x1xf32, #tpu.memory_space<vmem>>, vector<1x1xf32>
    %114 = vector.extract %113[0, 0] : f32 from vector<1x1xf32>
    %115 = vector.broadcast %114 : f32 to vector<8x32xf32>
    %116 = arith.mulf %115, %107 : vector<8x32xf32>
    %117 = arith.negf %116 : vector<8x32xf32>
    %118 = math.exp %117 : vector<8x32xf32>
    %cst_52 = arith.constant 1.000000e+00 : f32
    %119 = vector.broadcast %cst_52 : f32 to vector<8x32xf32>
    %120 = arith.addf %119, %118 : vector<8x32xf32>
    %121 = arith.divf %119, %120 : vector<8x32xf32>
    %122 = arith.mulf %107, %121 : vector<8x32xf32>
    %123 = arith.mulf %122, %112 : vector<8x32xf32>
    %124 = arith.addf %95, %123 : vector<8x32xf32>
    %c0_53 = arith.constant 0 : index
    %c0_54 = arith.constant 0 : index
    %c0_55 = arith.constant 0 : index
    %125 = vector.load %arg16[%c0_53, %c0_54, %c0_55] : memref<1x8x32xf32, #tpu.memory_space<vmem>>, vector<1x8x32xf32>
    %126 = vector.shape_cast %125 : vector<1x8x32xf32> to vector<8x32xf32>
    %127 = vector.shape_cast %124 : vector<8x32xf32> to vector<1x8x32xf32>
    tpu.vector_store %arg16[%c0_53, %c0_54, %c0_55], %127 {strides = array<i32>} : memref<1x8x32xf32, #tpu.memory_space<vmem>>, vector<1x8x32xf32>,
    return
  }
  func.func @transform_0(%arg0: i32) -> (i32, i32, i32) {
    %c0_i32 = arith.constant 0 : i32
    %c0_i32_0 = arith.constant 0 : i32
    %c0_i32_1 = arith.constant 0 : i32
    return %arg0, %c0_i32, %c0_i32_0 : i32, i32, i32
  }
  func.func @transform_1(%arg0: i32) -> (i32, i32) {
    %c0_i32 = arith.constant 0 : i32
    %c0_i32_0 = arith.constant 0 : i32
    %c0_i32_1 = arith.constant 0 : i32
    return %c0_i32, %c0_i32_0 : i32, i32
  }
  func.func @transform_2(%arg0: i32) -> (i32, i32) {
    %c0_i32 = arith.constant 0 : i32
    %c0_i32_0 = arith.constant 0 : i32
    %c0_i32_1 = arith.constant 0 : i32
    return %c0_i32, %c0_i32_0 : i32, i32
  }
  func.func @transform_3(%arg0: i32) -> (i32, i32) {
    %c0_i32 = arith.constant 0 : i32
    %c0_i32_0 = arith.constant 0 : i32
    %c0_i32_1 = arith.constant 0 : i32
    return %c0_i32, %c0_i32_0 : i32, i32
  }
  func.func @transform_4(%arg0: i32) -> (i32, i32) {
    %c0_i32 = arith.constant 0 : i32
    %c0_i32_0 = arith.constant 0 : i32
    %c0_i32_1 = arith.constant 0 : i32
    return %c0_i32, %c0_i32_0 : i32, i32
  }
  func.func @transform_5(%arg0: i32) -> (i32, i32) {
    %c0_i32 = arith.constant 0 : i32
    %c0_i32_0 = arith.constant 0 : i32
    %c0_i32_1 = arith.constant 0 : i32
    return %c0_i32, %c0_i32_0 : i32, i32
  }
  func.func @transform_6(%arg0: i32) -> (i32, i32) {
    %c0_i32 = arith.constant 0 : i32
    %c0_i32_0 = arith.constant 0 : i32
    %c0_i32_1 = arith.constant 0 : i32
    return %c0_i32, %c0_i32_0 : i32, i32
  }
  func.func @transform_7(%arg0: i32) -> (i32, i32) {
    %c0_i32 = arith.constant 0 : i32
    %c0_i32_0 = arith.constant 0 : i32
    %c0_i32_1 = arith.constant 0 : i32
    return %c0_i32, %c0_i32_0 : i32, i32
  }
  func.func @transform_8(%arg0: i32) -> (i32, i32) {
    %c0_i32 = arith.constant 0 : i32
    %c0_i32_0 = arith.constant 0 : i32
    %c0_i32_1 = arith.constant 0 : i32
    return %c0_i32, %c0_i32_0 : i32, i32
  }
  func.func @transform_9(%arg0: i32) -> (i32, i32) {
    %c0_i32 = arith.constant 0 : i32
    %c0_i32_0 = arith.constant 0 : i32
    %c0_i32_1 = arith.constant 0 : i32
    return %c0_i32, %c0_i32_0 : i32, i32
  }
  func.func @transform_10(%arg0: i32) -> (i32, i32) {
    %c0_i32 = arith.constant 0 : i32
    %c0_i32_0 = arith.constant 0 : i32
    %c0_i32_1 = arith.constant 0 : i32
    return %c0_i32, %c0_i32_0 : i32, i32
  }
  func.func @transform_11(%arg0: i32) -> (i32, i32) {
    %c0_i32 = arith.constant 0 : i32
    %c0_i32_0 = arith.constant 0 : i32
    %c0_i32_1 = arith.constant 0 : i32
    return %c0_i32, %c0_i32_0 : i32, i32
  }
  func.func @transform_12(%arg0: i32) -> (i32, i32) {
    %c0_i32 = arith.constant 0 : i32
    %c0_i32_0 = arith.constant 0 : i32
    %c0_i32_1 = arith.constant 0 : i32
    return %c0_i32, %c0_i32_0 : i32, i32
  }
  func.func @transform_13(%arg0: i32) -> (i32, i32) {
    %c0_i32 = arith.constant 0 : i32
    %c0_i32_0 = arith.constant 0 : i32
    %c0_i32_1 = arith.constant 0 : i32
    return %c0_i32, %c0_i32_0 : i32, i32
  }
  func.func @transform_14(%arg0: i32) -> (i32, i32) {
    %c0_i32 = arith.constant 0 : i32
    %c0_i32_0 = arith.constant 0 : i32
    %c0_i32_1 = arith.constant 0 : i32
    return %c0_i32, %c0_i32_0 : i32, i32
  }
  func.func @transform_15(%arg0: i32) -> (i32, i32, i32) {
    %c0_i32 = arith.constant 0 : i32
    %c0_i32_0 = arith.constant 0 : i32
    %c0_i32_1 = arith.constant 0 : i32
    return %arg0, %c0_i32, %c0_i32_0 : i32, i32, i32
  }
}

</mosaic_0001>

<bundles_post_ra>
// kernel: _lambda_.5
= control target key start
LH: loop header
LB: loop body
LE: loop exit
PB: predicated region body
PF: predicated region fallthrough
CT: control target
= control target key end

     0   :  { %s1346_s0 = inlined_call_operand.vmem [shape: f32[2,8,32], index: 0, kind: input, shape index: {}]   ;;  %s1347_s1 = inlined_call_operand.hbm [shape: bf16[32,32], index: 1, kind: input, shape index: {}]   ;;  %s1348_s2 = inlined_call_operand.hbm [shape: f32[1,32], index: 2, kind: input, shape index: {}]   ;;  %s1349_s3 = inlined_call_operand.hbm [shape: bf16[32,32], index: 3, kind: input, shape index: {}]   ;;  %s1350_s4 = inlined_call_operand.hbm [shape: f32[1,32], index: 4, kind: input, shape index: {}]   ;;  %s1351_s5 = inlined_call_operand.hbm [shape: bf16[32,32], index: 5, kind: input, shape index: {}]   ;;  %s1352_s6 = inlined_call_operand.vmem [shape: f32[1,32], index: 6, kind: input, shape index: {}]   ;;  %s1353_s7 = inlined_call_operand.<no memory space> [shape: f32[1,1], index: 7, kind: input, shape index: {}]   ;;  %s1354_s8 = inlined_call_operand.vmem [shape: bf16[32,64], index: 8, kind: input, shape index: {}]   ;;  %s1355_s9 = inlined_call_operand.vmem [shape: f32[1,64], index: 9, kind: input, shape index: {}]   ;;  %s1356_s10 = inlined_call_operand.hbm [shape: f32[2,8,64], index: 10, kind: output, shape index: {}]  }
   0x1   :  { %1358 = sst [smem:[#allocation19_spill]] %s1347_s1  ;;  %v15_v0 = vstv %s1353_s7 }
   0x2   :  { %1359 = sst [smem:[#allocation20_spill]] %s1348_s2  ;;  %16 = vst [vmem:[#allocation2] sm:$0x1] %v15_v0 }
   0x3   :  { %1360 = sst [smem:[#allocation21_spill]] %s1350_s4 }
   0x4   :  { %17 = vsyncpa [#allocation4], 0 }
   0x5   :  { %18 = vsyncpa [#allocation7], 0 }
   0x6   :  { %19 = vsyncpa [#allocation10], 0 }
   0x7   :  { %20 = vsyncpa [#allocation5], 0 }
   0x8   :  { %22 = vsyncpa [#allocation5 + $0x1], 0  ;;  %s1193_s15 = smov 0   ;;  %s1195_s16 = smov 0  }
   0x9   :  { %s1197_s17 = smov 0   ;;  %s1199_s18 = smov 0  }
   0xa LB: > { %1361 = sst [smem:[#allocation17_spill]] %s1122_s17  ;;  %s1214_s7 = sadd.s32 4294967295, %s1126_s18   ;;  %s1126_s18 = sphi %s1199_s18, %s1374_s18   ;;  %s1122_s17 = sphi %s1197_s17, %s1371_s17   ;;  %s1118_s16 = sphi %s1195_s16, %s1373_s16   ;;  %s1114_s15 = sphi %s1193_s15, %s1372_s15  }
   0xb   : > { %s735_s19 = sadd.s32 4294967294, %s1126_s18   ;;  %s1218_s20 = sadd.s32 1, %s1126_s18  }
   0xc   : > { %s250_s21 = sadd.s32 1, %s1122_s17  ;;  %s247_s22 = ssub.s32 %s1126_s18, %s1218_s20 }
   0xd   : > { %p260_p0 = scmp.ne.s32.totalorder %s1122_s17, %s1118_s16  ;;  %p248_p1 = scmp.eq.s32.totalorder %s247_s22, 0 }
   0xe   : > { %p261_p2 = scmp.eq.s32.totalorder %s1214_s7, 1  ;;  %p266_p3 = scmp.ne.s32.totalorder %s1118_s16, %s1114_s15 }
   0xf   : > { %p267_p4 = scmp.eq.s32.totalorder %s735_s19, 1  ;;  %p736_p7 = scmp.ge.s32.totalorder %s1126_s18, 1 }
  0x10   : > { %s1229_s23 = scalar_select %p248_p1, %s1122_s17, %s250_s21  }
  0x11   : > { %p1231_p5 = por %p261_p2, %p260_p0  ;;  %p1235_p6 = por %p267_p4, %p266_p3 }
  0x12   : > { %1362 = sst [smem:[#allocation18_spill]] %s1229_s23  ;;  %p274_p8 = scmp.lt.s32.totalorder %s1126_s18, 3 }
  0x13   : > { %p844_p9 = scmp.eq.s32.totalorder %s1214_s7, 0  ;;  %s1366_s2 = sld [smem:[#allocation20_spill]] }
  0x14   : > { %p1242_p10 = pnand %p736_p7, %p274_p8  ;;  %s1128_s30 = smov [#allocation6]  }
  0x15   : > { %s302_s11 = sshll.u32 %s1128_s30, 4  ;;  %s1367_s4 = sld [smem:[#allocation21_spill]]  ;;  %s303_s11 = int_to_ptr.vmem [resolvable:$true] %s302_s11 }
  0x16   : > { %p824_p11 = pneg %p1242_p10  ;;  %s1369_s1 = sld [smem:[#allocation19_spill]] }
  0x17   : > { %s1129_s28 = smov [#allocation9]   ;;  %s1130_s12 = smov [#allocation3]  }
  0x18   : > { %p1256_p12 = pnand %p844_p9, %p824_p11  ;;  %s328_s30 = sshll.u32 %s1129_s28, 4  ;;  %s329_s30 = int_to_ptr.vmem [resolvable:$true] %s328_s30 }
  0x19   : > { %s300_s29 = sshll.u32 %s1366_s2, 4  ;;  %s287_s13 = sshll.u32 %s1130_s12, 4  ;;  %s301_s29 = int_to_ptr.hbm [resolvable:$true] %s300_s29  ;;  %s288_s13 = int_to_ptr.vmem [resolvable:$true] %s287_s13 }
  0x1a   : > { %830 = dma.hbm_to_vmem [thread:$0]  (!%p1256_p12), %s301_s29, 16, %s303_s11, [#allocation7]  }
  0x1b   : > { %s326_s14 = sshll.u32 %s1367_s4, 4  ;;  %s311_s23 = sshll.u32 %s1349_s3, 4  ;;  %s327_s14 = int_to_ptr.hbm [resolvable:$true] %s326_s14  ;;  %s312_s23 = int_to_ptr.hbm [resolvable:$true] %s311_s23 }
  0x1c   : > { %s285_s27 = sshll.u32 %s1369_s1, 4  ;;  %s1131_s17 = smov 64   ;;  %s286_s27 = int_to_ptr.hbm [resolvable:$true] %s285_s27 }
  0x1d   : > { %836 = dma.hbm_to_vmem [thread:$0]  (!%p1256_p12), %s327_s14, 16, %s329_s30, [#allocation10]  }
  0x1e   : > { %s1132_s21 = smov 4   ;;  %s1133_s22 = smov [#allocation8]  }
  0x1f   : > { %827 = dma.hbm_to_vmem [thread:$0]  (!%p1256_p12), %s286_s27, 256, %s288_s13, [#allocation4], %s1131_s17, %s1131_s17, %s1132_s21  }
  0x20   : > { %s313_s29 = sshll.u32 %s1133_s22, 4  ;;  %s337_s1 = sshll.u32 %s1351_s5, 4  ;;  %s314_s29 = int_to_ptr.vmem [resolvable:$true] %s313_s29  ;;  %s338_s1 = int_to_ptr.hbm [resolvable:$true] %s337_s1 }
  0x21   : > { %833 = dma.hbm_to_vmem [thread:$0]  (!%p1256_p12), %s312_s23, 256, %s314_s29, [#allocation7], %s1131_s17, %s1131_s17, %s1132_s21  }
  0x22   : > { %s1134_s14 = smov [#allocation11]   ;;  %374 = sbr.rel (%p1242_p10) target bundleno = 487 (0x1e7), region = 60 }
  0x23   : > { %s339_s30 = sshll.u32 %s1134_s14, 4  ;;  %s340_s30 = int_to_ptr.vmem [resolvable:$true] %s339_s30 }
  0x24   : > { %839 = dma.hbm_to_vmem [thread:$0]  (!%p1256_p12), %s338_s1, 256, %s340_s30, [#allocation10], %s1131_s17, %s1131_s17, %s1132_s21  }
  0x27   : > { %1097 = dma.done.wait (%p844_p9), [#allocation4], 256  }
  0x28   : > { %1099 = vsyncadd (%p844_p9), [#allocation4], 4294967040 }
  0x29   : > { %1101 = dma.done.wait (%p844_p9), [#allocation7], 272  }
  0x2a   : > { %1103 = vsyncadd (%p844_p9), [#allocation7], 4294967024 }
  0x2b   : > { %1105 = dma.done.wait (%p844_p9), [#allocation10], 272  }
  0x2c   : > { %1107 = vsyncadd (%p844_p9), [#allocation10], 4294967024  ;;  %p432_p13 = scmp.lt.s32.totalorder %s1214_s7, 1  ;;  %v793_v1 = vld [vmem:[#allocation3 + $0x8] sm:$0xff]  ;;  %v792_v2 = vld [vmem:[#allocation3] sm:$0xff]  ;;  %vm459_vm0 = vcmask 261120  }
  0x2d   : > { %v795_v3 = vld [vmem:[#allocation8 + $0x8] sm:$0xff]  ;;  %v797_v4 = vld [vmem:[#allocation11 + $0x8] sm:$0xff]  ;;  %469 = vmatpush.bf16.msra.mxu0 %v793_v1  ;;  %v796_v8 = vld [vmem:[#allocation11] sm:$0xff]  ;;  %s429_s29 = sand.u32 1, %s1118_s16   ;;  %s789_s11 = sshll.u32 %s1214_s7, 3  ;;  %vm608_vm5 = vcmask 523264  }
  0x2e   : > { %s433_s1 = scalar_select %p432_p13, %s1214_s7, 1  ;;  %506 = vmatpush.bf16.msra.mxu1 %v795_v3  ;;  %539 = vmatpush.bf16.msra.mxu2 %v797_v4  ;;  %v794_v7 = vld [vmem:[#allocation8] sm:$0xff]  ;;  %v546_v9 = vld [vmem:[#allocation2] sm:$0x1]  ;;  %v894_v10 = vld [vmem:[#allocation6] ss:$0 sm:$0xff] }
  0x2f   : > { %800 = vpush %v546_v9  ;;  %v895_v15 = vld [vmem:[#allocation9] ss:$0 sm:$0xff]  ;;  %v799_v16 = vld [vmem:[%s1354_s8 + $0x8] sm:$0xff]  ;;  %v896_v34 = vld [vmem:[%s1352_s6] ss:$0 sm:$0xff]  ;;  %s749_s28 = sshll.u32 %s429_s29, 3 }
  0x30   : > { %s750_s2 = sshll.u32 %s433_s1, 3  ;;  %601 = vmatpush.bf16.msra.mxu3 %v799_v16  ;;  %v798_v20 = vld [vmem:[%s1354_s8] sm:$0xff]  ;;  %s621_s1 = scalar_lea.hbm %s1356_s10, %s789_s11 }
  0x31   : > { %s435_s23 = scalar_lea.vmem %s1346_s0, %s750_s2  ;;  %470 = vmatpush.bf16.msra.mxu0 %v792_v2  ;;  %v897_v43 = vld [vmem:[%s1355_s9] ss:$0 sm:$0xff]  ;;  %s431_s17 = scalar_lea.vmem [#allocation12], %s749_s28 }
  0x32   : > { %v437_v5 = vld [vmem:[%s435_s23] sm:$0xff]  ;;  %507 = vmatpush.bf16.msra.mxu1 %v794_v7  ;;  %540 = vmatpush.bf16.msra.mxu2 %v796_v8  ;;  %s623_s23 = sshll.u32 %s431_s17, 4  ;;  %s611_s7 = scalar_lea.sflag [#allocation5], %s429_s29  ;;  %s624_s23 = int_to_ptr.vmem [resolvable:$true] %s623_s23 }
  0x33   : > { %v438_v6 = vpack.c.bf16 %v437_v5, %v437_v5  ;;  %s1072_s21 = scalar_lea.hbm %s1356_s10, 16 }
  0x34   : > { %602 = vmatpush.bf16.msra.mxu3 %v798_v20 }
  0x35   : > { %759 = vmatmul.msk.bf16.vlgmr.msra.gmra.mxu0 %vm459_vm0, %v438_v6 }
  0x60   : > { %s801_s26 = spop %800 }
  0x61   : > { %v548_v18 = vstv %s801_s26  ;;  %s625_s26 = sshll.u32 %s621_s1, 4  ;;  %s626_s26 = int_to_ptr.hbm [resolvable:$true] %s625_s26 }
  0x62   : > { %s1066_s19 = sshra.s32 %s626_s26, 4  ;;  %s1067_s19 = int_to_ptr.hbm [resolvable:$true] %s1066_s19 }
  0x63   : > { %s1068_s27 = scalar_lea.hbm %s1067_s19, 8  ;;  %p1073_p3 = scmp.lt.s32.totalorder %s1067_s19, %s1356_s10 }
  0x64   : > { %p1069_p0 = scmp.ne.s32.totalorder %s1067_s19, %s1068_s27  ;;  %p1074_p4 = scmp.lt.s32.totalorder %s1072_s21, %s1068_s27 }
  0x66   : > { %p1070_p1 = pnand %p1069_p0, %p1231_p5  ;;  %p1075_p7 = por %p1074_p4, %p1073_p3 }
  0x68   : > { %p1071_p2 = pneg %p1070_p1 }
  0x6a   : > { %p1076_p8 = pnand %p1075_p7, %p1071_p2 }
  0xb2   : > { %v472_v11 = vpop.f32.mrf.mxu0 }
  0xb3   : > { %v473_v12 = vadd.f32 %v894_v10, %v472_v11 }
  0xb5   : > { %v476_v13 = vpack.c.bf16 %v473_v12, %v473_v12 }
  0xb7   : > { %768 = vmatmul.msk.bf16.vlgmr.msra.gmra.mxu1 %vm459_vm0, %v476_v13  ;;  %777 = vmatmul.msk.bf16.vlgmr.msra.gmra.mxu2 %vm459_vm0, %v476_v13 }
  0xba   : > { %v474_v14 = vpop.f32.mrf.mxu0 }
 0x134   : > { %v509_v17 = vpop.f32.mrf.mxu1 }
 0x135   : > { %v510_v19 = vadd.f32 %v895_v15, %v509_v17 }
 0x137   : > { %v549_v21 = vmul.f32 %v548_v18, %v510_v19 }
 0x139   : > { %v778_v22 = vmul.f32 -1.442695, %v549_v21 }
 0x13a   : > { %v542_v23 = vpop.f32.mrf.mxu2 }
 0x13b   : > { %898 = vpow2.f32 %v778_v22  ;;  %v543_v39 = vadd.f32 %v896_v34, %v542_v23 }
 0x13c   : > { %v511_v24 = vpop.f32.mrf.mxu1 }
 0x141   : > { %v899_v25 = vpop.eup %898 }
 0x142   : > { %v553_v26 = vadd.f32 1.0, %v899_v25  ;;  %v544_v27 = vpop.f32.mrf.mxu2 }
 0x144   : > { %900 = vrcp.f32 %v553_v26  ;;  %v565_v31 = vand.u32 2147483648, %v553_v26  ;;  %v563_v33 = vand.u32 2147483647, %v553_v26  ;;  %vm559_vm2 = vweird.f32 %v553_v26 }
 0x146   : > { %v566_v36 = vor.u32 1.1754944e-38, %v565_v31  ;;  %vm564_vm4 = vcmp.eq.f32.partialorder %v563_v33, 8.507059e+37 }
 0x14a   : > { %v901_v28 = vpop.eup %900 }
 0x14b   : > { %v555_v29 = vmul.f32 %v901_v28, %v553_v26  ;;  %vm560_vm1 = vweird.f32 %v901_v28 }
 0x14c   : > { %vm561_vm3 = vmor %vm559_vm2, %vm560_vm1 }
 0x14d   : > { %v556_v30 = vsub.f32 1.0, %v555_v29 }
 0x14f   : > { %v557_v32 = vmul.f32 %v901_v28, %v556_v30 }
 0x151   : > { %v558_v35 = vadd.f32 %v901_v28, %v557_v32 }
 0x153   : > { %v562_v37 = vsel %vm561_vm3, %v901_v28, %v558_v35 }
 0x154   : > { %v567_v38 = vsel %vm564_vm4, %v566_v36, %v562_v37 }
 0x155   : > { %v569_v40 = vmul.f32 %v567_v38, %v510_v19 }
 0x157   : > { %v570_v41 = vmul.f32 %v569_v40, %v543_v39 }
 0x159   : > { %v571_v42 = vpack.c.bf16 %v570_v41, %v570_v41 }
 0x15b   : > { %787 = vmatmul.msk.bf16.vlgmr.msra.gmra.mxu3 %vm459_vm0, %v571_v42 }
 0x1de   : > { %v604_v44 = vpop.f32.mrf.mxu3 }
 0x1df   : > { %v605_v45 = vadd.f32 %v897_v43, %v604_v44 }
 0x1e1   : > { %609 = vst.msk [vmem:[%s431_s17] sm:$0xff] %vm608_vm5, %v605_v45 }
 0x1e2   : > { %1079 = shalt.err (!%p1076_p8)
}
 0x1e3   : > { %822 = dma.vmem_to_hbm [thread:$0]  (%p1231_p5), %s624_s23, 128, %s626_s26, %s611_s7  }
 0x1e6   : > { %v606_v46 = vpop.f32.mrf.mxu3 }
 0x1e7 PF: > { %p854_p9 = scmp.ge.s32.totalorder %s1126_s18, 2  ;;  %s637_s29 = sand.u32 1, %s1114_s15  }
 0x1e8   : > { %s638_s28 = scalar_lea.sflag [#allocation5], %s637_s29 }
 0x1e9   : > { %p841_p10 = pnand %p854_p9, %p1235_p6 }
 0x1eb   : > { %p842_p11 = pneg %p841_p10 }
 0x1ed   : > { %1109 = dma.done.wait (%p842_p11), %s638_s28, 128  }
 0x1ee   : > { %1111 = vsyncadd (%p842_p11), %s638_s28, 4294967168  ;;  %s1370_s14 = sld [smem:[#allocation17_spill]]  ;;  %p25_p12 = scmp.ge.s32.totalorder %s1218_s20, 4  }
 0x1ef   : > { %s1371_s17 = sld [smem:[#allocation18_spill]]  ;;  %s1372_s15 = smov %s1118_s16 }
 0x1f0   : > { %s1374_s18 = smov %s1218_s20  ;;  %27 = sbr.rel (!%p25_p12) target bundleno = 10 (0xa), region = 116 }
 0x1f4   : > { %s1373_s16 = smov %s1370_s14 }
 0x1f5   :  { %644 = vsyncpa [#allocation4], 1 }
 0x1f6   :  { %646 = vsyncpa [#allocation4 + $0x1], 1 }
 0x1f7   :  { %647 = vsyncpa [#allocation7], 1 }
 0x1f8   :  { %648 = vsyncpa [#allocation10], 1 }
 0x1f9   :  { %649 = vsyncpa [#allocation5], 1 }
 0x1fa   :  { %651 = vsyncpa [#allocation5 + $0x1], 1 }

// kernel: _lambda_.3
= control target key start
LH: loop header
LB: loop body
LE: loop exit
PB: predicated region body
PF: predicated region fallthrough
CT: control target
= control target key end

     0   :  { %s2036_s0 = inlined_call_operand.vmem [shape: f32[2,8,32], index: 0, kind: input, shape index: {}]   ;;  %s2037_s1 = inlined_call_operand.vmem [shape: f32[8,32], index: 1, kind: input, shape index: {}]   ;;  %s2038_s2 = inlined_call_operand.vmem [shape: bf16[32,320], index: 2, kind: input, shape index: {}]   ;;  %s2039_s3 = inlined_call_operand.hbm [shape: f32[8,64], index: 3, kind: input, shape index: {}]   ;;  %s2040_s4 = inlined_call_operand.hbm [shape: f32[8,64], index: 4, kind: input, shape index: {}]   ;;  %s2041_s5 = inlined_call_operand.vmem [shape: f32[8,8], index: 5, kind: input, shape index: {}]   ;;  %s2042_s6 = inlined_call_operand.vmem [shape: bf16[64,32], index: 6, kind: input, shape index: {}]   ;;  %s2043_s7 = inlined_call_operand.hbm [shape: f32[1,32], index: 7, kind: input, shape index: {}]   ;;  %s2044_s8 = inlined_call_operand.hbm [shape: bf16[32,32], index: 8, kind: input, shape index: {}]   ;;  %s2045_s9 = inlined_call_operand.hbm [shape: f32[1,32], index: 9, kind: input, shape index: {}]   ;;  %s2046_s10 = inlined_call_operand.hbm [shape: bf16[32,32], index: 10, kind: input, shape index: {}]   ;;  %s2047_s11 = inlined_call_operand.hbm [shape: f32[1,32], index: 11, kind: input, shape index: {}]   ;;  %s2048_s12 = inlined_call_operand.vmem [shape: bf16[32,32], index: 12, kind: input, shape index: {}]   ;;  %s2049_s13 = inlined_call_operand.hbm [shape: f32[1,32], index: 13, kind: input, shape index: {}]   ;;  %s2050_s14 = inlined_call_operand.<no memory space> [shape: f32[1,1], index: 14, kind: input, shape index: {}]   ;;  %s2051_s15 = inlined_call_operand.vmem [shape: f32[2,8,32], index: 15, kind: output, shape index: {}]  }
   0x1   :  { %2052 = sst [smem:[#allocation21_spill]] %s2040_s4  ;;  %v20_v0 = vstv %s2050_s14 }
   0x2   :  { %2053 = sst [smem:[#allocation22_spill]] %s2044_s8  ;;  %21 = vst [vmem:[#allocation2] sm:$0x1] %v20_v0 }
   0x3   :  { %2054 = sst [smem:[#allocation23_spill]] %s2046_s10 }
   0x4   :  { %22 = vsyncpa [#allocation4], 0 }
   0x5   :  { %23 = vsyncpa [#allocation6], 0 }
   0x6   :  { %24 = vsyncpa [#allocation9], 0 }
   0x7   :  { %25 = vsyncpa [#allocation12], 0 }
   0x8   :  { %26 = vsyncpa [#allocation15], 0  ;;  %s1841_s20 = smov 0  }
   0x9 LB: > { %s2055_s4 = sld [smem:[#allocation21_spill]]  ;;  %s1850_s23 = sadd.s32 4294967295, %s1744_s20   ;;  %s1744_s20 = sphi %s1841_s20, %s32_s20  }
   0xa   : > { %p1239_p0 = scmp.ge.s32.totalorder %s1744_s20, 1  ;;  %p383_p1 = scmp.lt.s32.totalorder %s1744_s20, 3 }
   0xb   : > { %p1422_p2 = scmp.eq.s32.totalorder %s1850_s23, 0  ;;  %s1746_s25 = smov [#allocation5]  }
   0xc   : > { %p1855_p3 = pnand %p1239_p0, %p383_p1  ;;  %s415_s26 = sshll.u32 %s1746_s25, 4  ;;  %s416_s26 = int_to_ptr.vmem [resolvable:$true] %s415_s26 }
   0xd   : > { %s2057_s8 = sld [smem:[#allocation22_spill]]  ;;  %s1747_s16 = smov [#allocation8]  }
   0xe   : > { %p1397_p4 = pneg %p1855_p3  ;;  %s444_s17 = sshll.u32 %s1747_s16, 4  ;;  %s445_s17 = int_to_ptr.vmem [resolvable:$true] %s444_s17 }
   0xf   : > { %s413_s14 = sshll.u32 %s2055_s4, 4  ;;  %s2059_s10 = sld [smem:[#allocation23_spill]]  ;;  %s414_s14 = int_to_ptr.hbm [resolvable:$true] %s413_s14 }
  0x10   : > { %p1866_p5 = pnand %p1422_p2, %p1397_p4  ;;  %s1748_s22 = smov 64  }
  0x11   : > { %s1749_s25 = smov 4   ;;  %s1750_s27 = smov [#allocation11]  }
  0x12   : > { %1403 = dma.hbm_to_vmem [thread:$0]  (!%p1866_p5), %s414_s14, 128, %s416_s26, [#allocation6]  }
  0x13   : > { %s442_s29 = sshll.u32 %s2057_s8, 4  ;;  %s470_s28 = sshll.u32 %s1750_s27, 4  ;;  %s443_s29 = int_to_ptr.hbm [resolvable:$true] %s442_s29  ;;  %s471_s28 = int_to_ptr.vmem [resolvable:$true] %s470_s28 }
  0x14   : > { %1409 = dma.hbm_to_vmem [thread:$0]  (!%p1866_p5), %s443_s29, 256, %s445_s17, [#allocation9], %s1748_s22, %s1748_s22, %s1749_s25  }
  0x15   : > { %s468_s21 = sshll.u32 %s2059_s10, 4  ;;  %s401_s16 = sshll.u32 %s2039_s3, 4  ;;  %s469_s21 = int_to_ptr.hbm [resolvable:$true] %s468_s21  ;;  %s402_s16 = int_to_ptr.hbm [resolvable:$true] %s401_s16 }
  0x16   : > { %1415 = dma.hbm_to_vmem [thread:$0]  (!%p1866_p5), %s469_s21, 256, %s471_s28, [#allocation12], %s1748_s22, %s1748_s22, %s1749_s25  }
  0x17   : > { %s431_s14 = sshll.u32 %s2043_s7, 4  ;;  %s1751_s26 = smov [#allocation3]   ;;  %s432_s14 = int_to_ptr.hbm [resolvable:$true] %s431_s14 }
  0x18   : > { %s403_s10 = sshll.u32 %s1751_s26, 4  ;;  %s1752_s29 = smov [#allocation7]   ;;  %s404_s10 = int_to_ptr.vmem [resolvable:$true] %s403_s10 }
  0x19   : > { %1400 = dma.hbm_to_vmem [thread:$0]  (!%p1866_p5), %s402_s16, 128, %s404_s10, [#allocation4]  }
  0x1a   : > { %s433_s4 = sshll.u32 %s1752_s29, 4  ;;  %s457_s27 = sshll.u32 %s2045_s9, 4  ;;  %s434_s4 = int_to_ptr.vmem [resolvable:$true] %s433_s4  ;;  %s458_s27 = int_to_ptr.hbm [resolvable:$true] %s457_s27 }
  0x1b   : > { %1406 = dma.hbm_to_vmem [thread:$0]  (!%p1866_p5), %s432_s14, 16, %s434_s4, [#allocation6]  }
  0x1c   : > { %s483_s25 = sshll.u32 %s2047_s11, 4  ;;  %s1753_s28 = smov [#allocation10]   ;;  %s484_s25 = int_to_ptr.hbm [resolvable:$true] %s483_s25 }
  0x1d   : > { %s459_s18 = sshll.u32 %s1753_s28, 4  ;;  %s1754_s10 = smov [#allocation13]   ;;  %s460_s18 = int_to_ptr.vmem [resolvable:$true] %s459_s18 }
  0x1e   : > { %1412 = dma.hbm_to_vmem [thread:$0]  (!%p1866_p5), %s458_s27, 16, %s460_s18, [#allocation9]  }
  0x1f   : > { %s485_s16 = sshll.u32 %s1754_s10, 4  ;;  %s498_s29 = sshll.u32 %s2049_s13, 4  ;;  %s486_s16 = int_to_ptr.vmem [resolvable:$true] %s485_s16  ;;  %s499_s29 = int_to_ptr.hbm [resolvable:$true] %s498_s29 }
  0x20   : > { %1418 = dma.hbm_to_vmem [thread:$0]  (!%p1866_p5), %s484_s25, 16, %s486_s16, [#allocation12]  }
  0x21   : > { %s1755_s14 = smov [#allocation14]   ;;  %523 = sbr.rel (%p1855_p3) target bundleno = 1880 (0x758), region = 80 }
  0x22   : > { %s500_s4 = sshll.u32 %s1755_s14, 4  ;;  %s501_s4 = int_to_ptr.vmem [resolvable:$true] %s500_s4 }
  0x23   : > { %1421 = dma.hbm_to_vmem [thread:$0]  (!%p1866_p5), %s499_s29, 16, %s501_s4, [#allocation15]  }
  0x26   : > { %1723 = dma.done.wait (%p1422_p2), [#allocation4], 128  }
  0x27   : > { %1725 = vsyncadd (%p1422_p2), [#allocation4], 4294967168 }
  0x28   : > { %1727 = dma.done.wait (%p1422_p2), [#allocation6], 144  }
  0x29   : > { %1729 = vsyncadd (%p1422_p2), [#allocation6], 4294967152 }
  0x2a   : > { %1731 = dma.done.wait (%p1422_p2), [#allocation9], 272  }
  0x2b   : > { %1733 = vsyncadd (%p1422_p2), [#allocation9], 4294967024 }
  0x2c   : > { %1735 = dma.done.wait (%p1422_p2), [#allocation12], 272  }
  0x2d   : > { %1737 = vsyncadd (%p1422_p2), [#allocation12], 4294967024 }
  0x2e   : > { %1739 = dma.done.wait (%p1422_p2), [#allocation15], 16  }
  0x2f   : > { %1741 = vsyncadd (%p1422_p2), [#allocation15], 4294967280  ;;  %p605_p6 = scmp.lt.s32.totalorder %s1850_s23, 1  ;;  %vm617_vm0 = vcmask 261120   ;;  %v1274_v19 = vld [vmem:[%s2038_s2 + $0x18] sm:$0xf] }
  0x30   : > { %v1343_v20 = vld [vmem:[%s2038_s2 + $0x20] sm:$0xf0]  ;;  %v1342_v21 = vld [vmem:[%s2038_s2 + $0x1c] sm:$0xf]  ;;  %v1276_v23 = vld [vmem:[%s2038_s2 + $0x24] sm:$0xf0] }
  0x31   : > { %s2061_s23 = smov (!%p605_p6, %s1850_s23), 1  ;;  %v1275_v22 = vor.u32 %v1343_v20, %v1274_v19  ;;  %v1282_v24 = vld [vmem:[%s2038_s2 + $0x20] sm:$0xf]  ;;  %v1344_v25 = vld [vmem:[%s2038_s2 + $0x28] sm:$0xf0]  ;;  %v1279_v26 = vor.u32 %v1342_v21, %v1276_v23  ;;  %s1756_s29 = smov 64  }
  0x32   : > { %s1258_s24 = sshll.u32 %s2061_s23, 3  ;;  %v1283_v27 = vor.u32 %v1344_v25, %v1282_v24  ;;  %v1262_v28 = vld [vmem:[%s2038_s2] sm:$0xf]  ;;  %v1340_v29 = vld [vmem:[%s2038_s2 + $0x8] sm:$0xf0]  ;;  %vm796_vm4 = vcmask 1043456  }
  0x33   : > { %s608_s17 = scalar_lea.vmem %s2036_s0, %s1258_s24  ;;  %694 = vmatpush.bf16.msra.mxu0 %v1275_v22  ;;  %707 = vmatpush.bf16.msra.mxu1 %v1279_v26  ;;  %v1339_v30 = vld [vmem:[%s2038_s2 + $0x4] sm:$0xf]  ;;  %v1263_v31 = vor.u32 %v1340_v29, %v1262_v28  ;;  %v1264_v32 = vld [vmem:[%s2038_s2 + $0xc] sm:$0xf0]  ;;  %v1270_v33 = vld [vmem:[%s2038_s2 + $0x8] sm:$0xf]  ;;  %s612_s25 = scalar_lea.vmem %s2051_s15, %s1258_s24 }
  0x34   : > { %v614_v1 = vld [vmem:[%s608_s17] sm:$0xff]  ;;  %720 = vmatpush.bf16.msra.mxu2 %v1283_v27  ;;  %v1341_v34 = vld [vmem:[%s2038_s2 + $0x10] sm:$0xf0]  ;;  %v1267_v35 = vor.u32 %v1339_v30, %v1264_v32  ;;  %v728_v37 = vld [vmem:[#allocation5] sm:$0xff]  ;;  %s1757_s8 = smov 96   ;;  %vm780_vm5 = vcmask 64512  }
  0x35   : > { %v616_v2 = vmul.f32 %v614_v1, %v614_v1  ;;  %v1271_v36 = vor.u32 %v1341_v34, %v1270_v33  ;;  %v1976_v38 = vld [vmem:[%s2037_s1] sm:$0xff] }
  0x36   : > { %v727_v54 = vld [vmem:[#allocation3] sm:$0xff] }
  0x37   : > { %v618_v3 = vsel %vm617_vm0, %v616_v2, 0.0  ;;  %695 = vmatpush.bf16.msra.mxu0 %v1263_v31  ;;  %708 = vmatpush.bf16.msra.mxu1 %v1267_v35 }
  0x38   : > { %619 = vadd.xlane.f32.xlu0 %v618_v3  ;;  %721 = vmatpush.bf16.msra.mxu2 %v1271_v36  ;;  %v1346_v36 = vld [vmem:[%s2042_s6 + $0x8] sm:$0xff] }
  0x4c   : > { %731 = vrot.lane.b32.xlu0 %v728_v37, %s1756_s29 }
  0xab   : > { %v620_v4 = vpop.xlane.xlu0 %619 }
  0xac   : > { %v621_v5 = vrot.slane %v620_v4, 4 }
  0xae   : > { %v622_v6 = vadd.f32 %v621_v5, %v620_v4 }
  0xb0   : > { %v623_v7 = vrot.slane %v622_v6, 2 }
  0xb2   : > { %v624_v8 = vadd.f32 %v623_v7, %v622_v6 }
  0xb4   : > { %v625_v9 = vrot.slane %v624_v8, 1 }
  0xb6   : > { %v626_v10 = vadd.f32 %v625_v9, %v624_v8  ;;  %v750_v8 = vld [vmem:[%s2041_s5] sm:$0xff] }
  0xb8   : > { %1355 = vpush %v626_v10 }
  0xbe   : > { %v732_v43 = vpop.permute.xlu0 %731 }
  0xe9   : > { %s1356_s27 = spop %1355 }
  0xea   : > { %s628_s21 = smul.f32 0.00390625, %s1356_s27 }
  0xec   : > { %v629_v11 = vstv %s628_s21 }
  0xed   : > { %1462 = vrsqrt.f32 %v629_v11  ;;  %vm636_vm2 = vweird.f32 %v629_v11 }
  0xf3   : > { %v1463_v12 = vpop.eup %1462 }
  0xf4   : > { %v631_v13 = vmul.f32 %v1463_v12, %v629_v11  ;;  %vm637_vm1 = vweird.f32 %v1463_v12 }
  0xf5   : > { %vm638_vm3 = vmor %vm636_vm2, %vm637_vm1 }
  0xf6   : > { %v632_v14 = vmul.f32 %v1463_v12, %v631_v13 }
  0xf8   : > { %v633_v15 = vmul.f32 0.5, %v632_v14 }
  0xfa   : > { %v634_v16 = vsub.f32 1.5, %v633_v15 }
  0xfc   : > { %v635_v17 = vmul.f32 %v1463_v12, %v634_v16 }
  0xfe   : > { %v639_v18 = vsel %vm638_vm3, %v1463_v12, %v635_v17 }
  0xff   : > { %1357 = vpush %v639_v18 }
 0x130   : > { %s1358_s14 = spop %1357 }
 0x131   : > { %v641_v39 = vstv %s1358_s14 }
 0x132   : > { %v642_v40 = vmul.f32 %v641_v39, %v614_v1 }
 0x134   : > { %v1979_v41 = vmul.f32 %v642_v40, %v1976_v38 }
 0x136   : > { %v644_v42 = vpack.c.bf16 %v1979_v41, %v1979_v41 }
 0x138   : > { %1284 = vmatmul.msk.bf16.vlgmr.msra.gmra.mxu0 %vm617_vm0, %v644_v42  ;;  %1285 = vmatmul.msk.bf16.vlgmr.msra.gmra.mxu1 %vm617_vm0, %v644_v42 }
 0x139   : > { %1286 = vmatmul.msk.bf16.vlgmr.msra.gmra.mxu2 %vm617_vm0, %v644_v42 }
 0x1b5   : > { %v697_v44 = vpop.f32.mrf.mxu0  ;;  %v710_v45 = vpop.f32.mrf.mxu1 }
 0x1b6   : > { %v741_v46 = vmul.f32 %v732_v43, %v710_v45  ;;  %v734_v51 = vmul.f32 %v732_v43, %v697_v44  ;;  %v740_v55 = vmul.f32 %v727_v54, %v710_v45  ;;  %v729_v61 = vmul.f32 %v727_v54, %v697_v44  ;;  %v1345_v43 = vld [vmem:[%s2042_s6] sm:$0xff]  ;;  %v1348_v44 = vld [vmem:[%s2042_s6 + $0x18] sm:$0xff] }
 0x1b8   : > { %743 = vrot.lane.b32.xlu1 %v741_v46, %s1756_s29 }
 0x1bc   : > { %v723_v47 = vpop.f32.mrf.mxu2 }
 0x1bd   : > { %v749_v48 = vpack.c.bf16 %v723_v47, %v723_v47  ;;  %v699_v49 = vpop.f32.mrf.mxu0  ;;  %v712_v50 = vpop.f32.mrf.mxu1 }
 0x1bf   : > { %v798_v52 = vsel %vm796_vm4, %v749_v48, 0  ;;  %v858_v13 = vunpack.c.l.b16 %v749_v48  ;;  %v1347_v48 = vld [vmem:[%s2042_s6 + $0x10] sm:$0xff] }
 0x1c0   : > { %807 = vmatpush.bf16.msrb.mxu0 %v798_v52  ;;  %736 = vrot.lane.b32.xlu1 %v734_v51, %s1756_s29 }
 0x1c1   : > { %v859_v14 = vpack.c.b16 %v858_v13, %v858_v13  ;;  %v1349_v13 = vld [vmem:[#allocation8] sm:$0xff] }
 0x1c4   : > { %v725_v53 = vpop.f32.mrf.mxu2  ;;  %931 = vmatpush.bf16.msra.mxu0 %v1346_v36 }
 0x1c8   : > { %932 = vmatpush.bf16.msra.mxu0 %v1345_v43 }
 0x22a   : > { %v744_v56 = vpop.permute.xlu1 %743 }
 0x22b   : > { %v746_v57 = vadd.f32 %v744_v56, %v740_v55  ;;  %v1458_v56 = vld [vmem:[#allocation7] ss:$0 sm:$0xff] }
 0x22d   : > { %v748_v58 = vpack.c.bf16 %v746_v57, %v746_v57 }
 0x22f   : > { %v763_v59 = vsel %vm617_vm0, %v748_v58, 0  ;;  %v820_v60 = vunpack.c.l.b16 %v748_v58 }
 0x230   : > { %772 = vmatpush.bf16.xpose.msra.mxu3 %v763_v59 }
 0x231   : > { %v821_v62 = vpack.c.b16 %v820_v60, %v820_v60 }
 0x232   : > { %v737_v63 = vpop.permute.xlu1 %736 }
 0x233   : > { %v739_v0 = vadd.f32 %v737_v63, %v729_v61  ;;  %822 = vrot.lane.b32.xlu2 %v821_v62, %s1757_s8 }
 0x235   : > { %v747_v1 = vpack.c.bf16 %v739_v0, %v739_v0 }
 0x237   : > { %v815_v2 = vunpack.c.l.b16 %v747_v1  ;;  %1287 = vmatmul.msk.bf16.vlgmr.msra.gmra.mxu3 %vm617_vm0, %v747_v1 }
 0x238   : > { %903 = vmatpush.bf16.msrb.mxu3 %v1348_v44 }
 0x239   : > { %v816_v3 = vpack.c.b16 %v815_v2, %v815_v2 }
 0x23b   : > { %817 = vrot.lane.b32.xlu2 %v816_v3, %s1757_s8 }
 0x23c   : > { %904 = vmatpush.bf16.msrb.mxu3 %v1347_v48 }
 0x28d   : > { %v823_v4 = vpop.permute.xlu2 %822 }
 0x28e   : > { %v828_v5 = vsel %vm617_vm0, %v823_v4, 0 }
 0x28f   : > { %837 = vmatpush.bf16.xpose.msrb.mxu1 %v828_v5 }
 0x295   : > { %v818_v6 = vpop.permute.xlu2 %817 }
 0x296   : > { %1289 = vmatmul.msk.bf16.vlgmr.msrb.gmra.mxu1 %vm617_vm0, %v818_v6 }
 0x2ba   : > { %v774_v7 = vpop.f32.mrf.mxu3 }
 0x2bb   : > { %v778_v9 = vmul.f32 0.17677669, %v774_v7 }
 0x2bd   : > { %v779_v10 = vadd.f32 %v778_v9, %v750_v8 }
 0x2bf   : > { %v781_v11 = vsel %vm780_vm5, %v779_v10, -inf }
 0x2c0   : > { %782 = vmax.xlane.f32.xlu2 %v781_v11 }
 0x2c2   : > { %v776_v12 = vpop.f32.mrf.mxu3 }
 0x2c3   : > { %v1350_v12 = vld [vmem:[#allocation8 + $0x8] sm:$0xff] }
 0x2c4   : > { %1001 = vmatpush.bf16.msra.mxu1 %v1350_v12 }
 0x2c8   : > { %1002 = vmatpush.bf16.msra.mxu1 %v1349_v13 }
 0x2d8   : > { %860 = vrot.lane.b32.xlu2 %v859_v14, %s1757_s8  ;;  %v1352_v14 = vld [vmem:[#allocation11 + $0x8] sm:$0xff] }
 0x313   : > { %v839_v15 = vpop.f32.mrf.mxu1 }
 0x314   : > { %v843_v16 = vmul.f32 0.17677669, %v839_v15  ;;  %v1354_v15 = vld [vmem:[%s2048_s12 + $0x8] sm:$0xff] }
 0x315   : > { %1071 = vmatpush.bf16.msra.mxu3 %v1354_v15 }
 0x316   : > { %v844_v17 = vadd.f32 %v843_v16, %v750_v8 }
 0x318   : > { %v845_v18 = vsel %vm780_vm5, %v844_v17, -inf }
 0x319   : > { %846 = vmax.xlane.f32.xlu1 %v845_v18 }
 0x31b   : > { %v841_v19 = vpop.f32.mrf.mxu1 }
 0x333   : > { %v783_v20 = vpop.xlane.xlu2 %782 }
 0x334   : > { %v784_v21 = vsub.f32 %v779_v10, %v783_v20  ;;  %v1351_v20 = vld [vmem:[#allocation11] sm:$0xff] }
 0x336   : > { %v785_v22 = vmul.f32 1.442695, %v784_v21  ;;  %v1353_v21 = vld [vmem:[%s2048_s12] sm:$0xff] }
 0x337   : > { %1072 = vmatpush.bf16.msra.mxu3 %v1353_v21 }
 0x338   : > { %1464 = vpow2.f32 %v785_v22  ;;  %v1078_v22 = vld [vmem:[#allocation2] sm:$0x1] }
 0x33b   : > { %v861_v23 = vpop.permute.xlu2 %860 }
 0x33c   : > { %v866_v24 = vsel %vm796_vm4, %v861_v23, 0  ;;  %v1459_v23 = vld [vmem:[#allocation10] ss:$0 sm:$0xff] }
 0x33d   : > { %875 = vmatpush.bf16.msrb.mxu2 %v866_v24 }
 0x33e   : > { %v1465_v25 = vpop.eup %1464 }
 0x33f   : > { %v787_v26 = vsel %vm780_vm5, %v1465_v25, 0.0 }
 0x340   : > { %788 = vadd.xlane.f32.xlu1 %v787_v26 }
 0x341   : > { %1038 = vmatpush.bf16.msra.mxu2 %v1352_v14 }
 0x345   : > { %1039 = vmatpush.bf16.msra.mxu2 %v1351_v20 }
 0x38c   : > { %v847_v27 = vpop.xlane.xlu1 %846 }
 0x38d   : > { %v848_v28 = vsub.f32 %v844_v17, %v847_v27  ;;  %v1460_v27 = vld [vmem:[#allocation13] ss:$0 sm:$0xff] }
 0x38f   : > { %v849_v29 = vmul.f32 1.442695, %v848_v28 }
 0x391   : > { %1466 = vpow2.f32 %v849_v29 }
 0x397   : > { %v1467_v30 = vpop.eup %1466 }
 0x398   : > { %v851_v31 = vsel %vm780_vm5, %v1467_v30, 0.0 }
 0x399   : > { %852 = vadd.xlane.f32.xlu0 %v851_v31 }
 0x3b3   : > { %v789_v32 = vpop.xlane.xlu1 %788 }
 0x3b4   : > { %1468 = vrcp.f32 %v789_v32 }
 0x3ba   : > { %v1469_v33 = vpop.eup %1468 }
 0x3bb   : > { %v791_v34 = vmul.f32 %v1469_v33, %v1465_v25 }
 0x3bd   : > { %v792_v35 = vpack.c.bf16 %v791_v34, %v791_v34 }
 0x3bf   : > { %1288 = vmatmul.msk.bf16.vlgmr.msrb.gmra.mxu0 %vm780_vm5, %v792_v35 }
 0x40c   : > { %v853_v37 = vpop.xlane.xlu0 %852 }
 0x40d   : > { %1470 = vrcp.f32 %v853_v37 }
 0x413   : > { %v1471_v39 = vpop.eup %1470 }
 0x414   : > { %v855_v40 = vmul.f32 %v1471_v39, %v1467_v30 }
 0x416   : > { %v856_v42 = vpack.c.bf16 %v855_v40, %v855_v40 }
 0x418   : > { %1290 = vmatmul.msk.bf16.vlgmr.msrb.gmra.mxu2 %vm780_vm5, %v856_v42 }
 0x43c   : > { %v809_v45 = vpop.f32.mrf.mxu0 }
 0x43d   : > { %v813_v46 = vpack.c.bf16 %v809_v45, %v809_v45 }
 0x43f   : > { %1308 = vmatmul.msk.bf16.vlgmr.msra.gmra.mxu0 %vm617_vm0, %v813_v46  ;;  %v1461_v46 = vld [vmem:[#allocation14] ss:$0 sm:$0xff] }
 0x444   : > { %v811_v47 = vpop.f32.mrf.mxu0 }
 0x49b   : > { %v877_v49 = vpop.f32.mrf.mxu2 }
 0x49c   : > { %v881_v50 = vpack.c.bf16 %v877_v49, %v877_v49 }
 0x49e   : > { %1299 = vmatmul.msk.bf16.vlgmr.msrb.gmra.mxu3 %vm617_vm0, %v881_v50 }
 0x4a3   : > { %v879_v51 = vpop.f32.mrf.mxu2 }
 0x4bc   : > { %v934_v52 = vpop.f32.mrf.mxu0 }
 0x4c4   : > { %v936_v53 = vpop.f32.mrf.mxu0 }
 0x521   : > { %v906_v54 = vpop.f32.mrf.mxu3 }
 0x522   : > { %v935_v55 = vadd.f32 %v934_v52, %v906_v54 }
 0x524   : > { %v938_v57 = vadd.f32 %v935_v55, %v1979_v41 }
 0x526   : > { %v943_v58 = vadd.f32 %v1458_v56, %v938_v57 }
 0x528   : > { %v944_v59 = vmul.f32 %v943_v58, %v943_v58 }
 0x529   : > { %v908_v60 = vpop.f32.mrf.mxu3 }
 0x52a   : > { %v945_v61 = vsel %vm617_vm0, %v944_v59, 0.0 }
 0x52b   : > { %946 = vadd.xlane.f32.xlu1 %v945_v61 }
 0x59e   : > { %v947_v62 = vpop.xlane.xlu1 %946 }
 0x59f   : > { %v948_v63 = vrot.slane %v947_v62, 4 }
 0x5a1   : > { %v949_v0 = vadd.f32 %v948_v63, %v947_v62 }
 0x5a3   : > { %v950_v1 = vrot.slane %v949_v0, 2 }
 0x5a5   : > { %v951_v2 = vadd.f32 %v950_v1, %v949_v0 }
 0x5a7   : > { %v952_v3 = vrot.slane %v951_v2, 1 }
 0x5a9   : > { %v953_v4 = vadd.f32 %v952_v3, %v951_v2 }
 0x5ab   : > { %1359 = vpush %v953_v4 }
 0x5dc   : > { %s1360_s26 = spop %1359 }
 0x5dd   : > { %s955_s29 = smul.f32 0.00390625, %s1360_s26 }
 0x5df   : > { %v956_v5 = vstv %s955_s29 }
 0x5e0   : > { %1472 = vrsqrt.f32 %v956_v5  ;;  %vm963_vm7 = vweird.f32 %v956_v5 }
 0x5e6   : > { %v1473_v6 = vpop.eup %1472 }
 0x5e7   : > { %v958_v41 = vmul.f32 %v1473_v6, %v956_v5  ;;  %vm964_vm6 = vweird.f32 %v1473_v6 }
 0x5e8   : > { %vm965_vm8 = vmor %vm963_vm7, %vm964_vm6 }
 0x5e9   : > { %v959_v7 = vmul.f32 %v1473_v6, %v958_v41 }
 0x5eb   : > { %v960_v8 = vmul.f32 0.5, %v959_v7 }
 0x5ed   : > { %v961_v9 = vsub.f32 1.5, %v960_v8 }
 0x5ef   : > { %v962_v10 = vmul.f32 %v1473_v6, %v961_v9 }
 0x5f1   : > { %v966_v11 = vsel %vm965_vm8, %v1473_v6, %v962_v10 }
 0x5f2   : > { %1361 = vpush %v966_v11 }
 0x5f3   : > { %1363 = vpush %v1078_v22 }
 0x623   : > { %s1362_s30 = spop %1361 }
 0x624   : > { %v968_v16 = vstv %s1362_s30  ;;  %s1364_s27 = spop %1363 }
 0x625   : > { %v969_v17 = vmul.f32 %v968_v16, %v943_v58  ;;  %v1080_v30 = vstv %s1364_s27 }
 0x627   : > { %v970_v18 = vmul.f32 %v969_v17, %v1976_v38 }
 0x629   : > { %v971_v19 = vpack.c.bf16 %v970_v18, %v970_v18 }
 0x62b   : > { %1317 = vmatmul.msk.bf16.vlgmr.msra.gmra.mxu1 %vm617_vm0, %v971_v19 }
 0x6a8   : > { %v1004_v24 = vpop.f32.mrf.mxu1 }
 0x6a9   : > { %v1005_v25 = vadd.f32 %v1459_v23, %v1004_v24 }
 0x6ab   : > { %v1008_v26 = vpack.c.bf16 %v1005_v25, %v1005_v25 }
 0x6ad   : > { %1326 = vmatmul.msk.bf16.vlgmr.msra.gmra.mxu2 %vm617_vm0, %v1008_v26  ;;  %1335 = vmatmul.msk.bf16.vlgmr.msra.gmra.mxu3 %vm617_vm0, %v1008_v26 }
 0x6b0   : > { %v1006_v38 = vpop.f32.mrf.mxu1 }
 0x730   : > { %v1041_v28 = vpop.f32.mrf.mxu2  ;;  %v1074_v29 = vpop.f32.mrf.mxu3 }
 0x731   : > { %v1042_v31 = vadd.f32 %v1460_v27, %v1041_v28  ;;  %v1075_v51 = vadd.f32 %v1461_v46, %v1074_v29 }
 0x733   : > { %v1081_v32 = vmul.f32 %v1080_v30, %v1042_v31 }
 0x735   : > { %v1336_v33 = vmul.f32 -1.442695, %v1081_v32 }
 0x737   : > { %1474 = vpow2.f32 %v1336_v33 }
 0x738   : > { %v1043_v34 = vpop.f32.mrf.mxu2  ;;  %v1076_v35 = vpop.f32.mrf.mxu3 }
 0x73d   : > { %v1475_v36 = vpop.eup %1474 }
 0x73e   : > { %v1085_v37 = vadd.f32 1.0, %v1475_v36 }
 0x740   : > { %1476 = vrcp.f32 %v1085_v37  ;;  %v1097_v43 = vand.u32 2147483648, %v1085_v37  ;;  %v1095_v45 = vand.u32 2147483647, %v1085_v37  ;;  %vm1091_vm10 = vweird.f32 %v1085_v37 }
 0x742   : > { %v1098_v48 = vor.u32 1.1754944e-38, %v1097_v43  ;;  %vm1096_vm12 = vcmp.eq.f32.partialorder %v1095_v45, 8.507059e+37 }
 0x746   : > { %v1477_v39 = vpop.eup %1476 }
 0x747   : > { %v1087_v40 = vmul.f32 %v1477_v39, %v1085_v37  ;;  %vm1092_vm9 = vweird.f32 %v1477_v39 }
 0x748   : > { %vm1093_vm11 = vmor %vm1091_vm10, %vm1092_vm9 }
 0x749   : > { %v1088_v42 = vsub.f32 1.0, %v1087_v40 }
 0x74b   : > { %v1089_v44 = vmul.f32 %v1477_v39, %v1088_v42 }
 0x74d   : > { %v1090_v47 = vadd.f32 %v1477_v39, %v1089_v44 }
 0x74f   : > { %v1094_v49 = vsel %vm1093_vm11, %v1477_v39, %v1090_v47 }
 0x750   : > { %v1099_v50 = vsel %vm1096_vm12, %v1098_v48, %v1094_v49 }
 0x751   : > { %v1101_v52 = vmul.f32 %v1099_v50, %v1042_v31 }
 0x753   : > { %v1102_v53 = vmul.f32 %v1101_v52, %v1075_v51 }
 0x755   : > { %v1103_v54 = vadd.f32 %v1102_v53, %v970_v18 }
 0x757   : > { %1104 = vst.msk [vmem:[%s612_s25] sm:$0xff] %vm617_vm0, %v1103_v54 }
 0x758 PF: > { %s32_s20 = sadd.s32 1, %s1744_s20  }
 0x759   : > { %p29_p7 = scmp.ge.s32.totalorder %s32_s20, 4  }
 0x75b   :  { %31 = sbr.rel (!%p29_p7) target bundleno = 9 (0x9), region = 143 }
 0x760   :  { %1124 = vsyncpa [#allocation4], 1 }
 0x761   :  { %1126 = vsyncpa [#allocation4 + $0x1], 1 }
 0x762   :  { %1127 = vsyncpa [#allocation6], 1 }
 0x763   :  { %1128 = vsyncpa [#allocation9], 1 }
 0x764   :  { %1129 = vsyncpa [#allocation12], 1 }
 0x765   :  { %1130 = vsyncpa [#allocation15], 1 }

// kernel: _lambda_.4
= control target key start
LH: loop header
LB: loop body
LE: loop exit
PB: predicated region body
PF: predicated region fallthrough
CT: control target
= control target key end

     0   :  { %s2103_s0 = inlined_call_operand.vmem [shape: f32[2,8,32], index: 0, kind: input, shape index: {}]   ;;  %s2104_s1 = inlined_call_operand.vmem [shape: f32[8,32], index: 1, kind: input, shape index: {}]   ;;  %s2105_s2 = inlined_call_operand.vmem [shape: bf16[32,320], index: 2, kind: input, shape index: {}]   ;;  %s2106_s3 = inlined_call_operand.hbm [shape: f32[8,64], index: 3, kind: input, shape index: {}]   ;;  %s2107_s4 = inlined_call_operand.hbm [shape: f32[8,64], index: 4, kind: input, shape index: {}]   ;;  %s2108_s5 = inlined_call_operand.vmem [shape: f32[8,8], index: 5, kind: input, shape index: {}]   ;;  %s2109_s6 = inlined_call_operand.vmem [shape: bf16[64,32], index: 6, kind: input, shape index: {}]   ;;  %s2110_s7 = inlined_call_operand.hbm [shape: f32[1,32], index: 7, kind: input, shape index: {}]   ;;  %s2111_s8 = inlined_call_operand.hbm [shape: bf16[32,32], index: 8, kind: input, shape index: {}]   ;;  %s2112_s9 = inlined_call_operand.hbm [shape: f32[1,32], index: 9, kind: input, shape index: {}]   ;;  %s2113_s10 = inlined_call_operand.hbm [shape: bf16[32,32], index: 10, kind: input, shape index: {}]   ;;  %s2114_s11 = inlined_call_operand.hbm [shape: f32[1,32], index: 11, kind: input, shape index: {}]   ;;  %s2115_s12 = inlined_call_operand.hbm [shape: bf16[32,32], index: 12, kind: input, shape index: {}]   ;;  %s2116_s13 = inlined_call_operand.hbm [shape: f32[1,32], index: 13, kind: input, shape index: {}]   ;;  %s2117_s14 = inlined_call_operand.<no memory space> [shape: f32[1,1], index: 14, kind: input, shape index: {}]   ;;  %s2118_s15 = inlined_call_operand.vmem [shape: f32[2,8,32], index: 15, kind: output, shape index: {}]  }
   0x1   :  { %2119 = sst [smem:[#allocation22_spill]] %s2107_s4  ;;  %v20_v0 = vstv %s2117_s14 }
   0x2   :  { %2120 = sst [smem:[#allocation23_spill]] %s2111_s8  ;;  %21 = vst [vmem:[#allocation2] sm:$0x1] %v20_v0 }
   0x3   :  { %2121 = sst [smem:[#allocation24_spill]] %s2113_s10 }
   0x4   :  { %22 = vsyncpa [#allocation4], 0 }
   0x5   :  { %23 = vsyncpa [#allocation6], 0 }
   0x6   :  { %24 = vsyncpa [#allocation9], 0 }
   0x7   :  { %25 = vsyncpa [#allocation12], 0 }
   0x8   :  { %26 = vsyncpa [#allocation15], 0  ;;  %s1909_s20 = smov 0  }
   0x9 LB: > { %s2122_s4 = sld [smem:[#allocation22_spill]]  ;;  %s1918_s23 = sadd.s32 4294967295, %s1811_s20   ;;  %s1811_s20 = sphi %s1909_s20, %s32_s20  }
   0xa   : > { %p1264_p0 = scmp.ge.s32.totalorder %s1811_s20, 1  ;;  %p383_p1 = scmp.lt.s32.totalorder %s1811_s20, 3 }
   0xb   : > { %p1456_p2 = scmp.eq.s32.totalorder %s1918_s23, 0  ;;  %s1813_s25 = smov [#allocation5]  }
   0xc   : > { %p1923_p3 = pnand %p1264_p0, %p383_p1  ;;  %s415_s26 = sshll.u32 %s1813_s25, 4  ;;  %s416_s26 = int_to_ptr.vmem [resolvable:$true] %s415_s26 }
   0xd   : > { %s2124_s8 = sld [smem:[#allocation23_spill]]  ;;  %s1814_s16 = smov [#allocation8]  }
   0xe   : > { %p1428_p4 = pneg %p1923_p3  ;;  %s444_s17 = sshll.u32 %s1814_s16, 4  ;;  %s445_s17 = int_to_ptr.vmem [resolvable:$true] %s444_s17 }
   0xf   : > { %s413_s14 = sshll.u32 %s2122_s4, 4  ;;  %s2126_s10 = sld [smem:[#allocation24_spill]]  ;;  %s414_s14 = int_to_ptr.hbm [resolvable:$true] %s413_s14 }
  0x10   : > { %p1934_p5 = pnand %p1456_p2, %p1428_p4  ;;  %s1815_s22 = smov 64  }
  0x11   : > { %s1816_s25 = smov 4   ;;  %s1817_s27 = smov [#allocation11]  }
  0x12   : > { %1434 = dma.hbm_to_vmem [thread:$0]  (!%p1934_p5), %s414_s14, 128, %s416_s26, [#allocation6]  }
  0x13   : > { %s442_s29 = sshll.u32 %s2124_s8, 4  ;;  %s470_s28 = sshll.u32 %s1817_s27, 4  ;;  %s443_s29 = int_to_ptr.hbm [resolvable:$true] %s442_s29  ;;  %s471_s28 = int_to_ptr.vmem [resolvable:$true] %s470_s28 }
  0x14   : > { %1440 = dma.hbm_to_vmem [thread:$0]  (!%p1934_p5), %s443_s29, 256, %s445_s17, [#allocation9], %s1815_s22, %s1815_s22, %s1816_s25  }
  0x15   : > { %s468_s21 = sshll.u32 %s2126_s10, 4  ;;  %s494_s16 = sshll.u32 %s2115_s12, 4  ;;  %s469_s21 = int_to_ptr.hbm [resolvable:$true] %s468_s21  ;;  %s495_s16 = int_to_ptr.hbm [resolvable:$true] %s494_s16 }
  0x16   : > { %1446 = dma.hbm_to_vmem [thread:$0]  (!%p1934_p5), %s469_s21, 256, %s471_s28, [#allocation12], %s1815_s22, %s1815_s22, %s1816_s25  }
  0x17   : > { %s401_s14 = sshll.u32 %s2106_s3, 4  ;;  %s1818_s26 = smov [#allocation14]   ;;  %s402_s14 = int_to_ptr.hbm [resolvable:$true] %s401_s14 }
  0x18   : > { %s496_s10 = sshll.u32 %s1818_s26, 4  ;;  %s1819_s29 = smov [#allocation3]   ;;  %s497_s10 = int_to_ptr.vmem [resolvable:$true] %s496_s10 }
  0x19   : > { %1452 = dma.hbm_to_vmem [thread:$0]  (!%p1934_p5), %s495_s16, 256, %s497_s10, [#allocation15], %s1815_s22, %s1815_s22, %s1816_s25  }
  0x1a   : > { %s403_s17 = sshll.u32 %s1819_s29, 4  ;;  %s431_s27 = sshll.u32 %s2110_s7, 4  ;;  %s404_s17 = int_to_ptr.vmem [resolvable:$true] %s403_s17  ;;  %s432_s27 = int_to_ptr.hbm [resolvable:$true] %s431_s27 }
  0x1b   : > { %1431 = dma.hbm_to_vmem [thread:$0]  (!%p1934_p5), %s402_s14, 128, %s404_s17, [#allocation4]  }
  0x1c   : > { %s457_s18 = sshll.u32 %s2112_s9, 4  ;;  %s1820_s19 = smov [#allocation7]   ;;  %s458_s18 = int_to_ptr.hbm [resolvable:$true] %s457_s18 }
  0x1d   : > { %s433_s26 = sshll.u32 %s1820_s19, 4  ;;  %s1821_s10 = smov [#allocation10]   ;;  %s434_s26 = int_to_ptr.vmem [resolvable:$true] %s433_s26 }
  0x1e   : > { %1437 = dma.hbm_to_vmem [thread:$0]  (!%p1934_p5), %s432_s27, 16, %s434_s26, [#allocation6]  }
  0x1f   : > { %s459_s22 = sshll.u32 %s1821_s10, 4  ;;  %s483_s29 = sshll.u32 %s2114_s11, 4  ;;  %s460_s22 = int_to_ptr.vmem [resolvable:$true] %s459_s22  ;;  %s484_s29 = int_to_ptr.hbm [resolvable:$true] %s483_s29 }
  0x20   : > { %1443 = dma.hbm_to_vmem [thread:$0]  (!%p1934_p5), %s458_s18, 16, %s460_s22, [#allocation9]  }
  0x21   : > { %s509_s4 = sshll.u32 %s2116_s13, 4  ;;  %s1822_s8 = smov [#allocation13]   ;;  %s510_s4 = int_to_ptr.hbm [resolvable:$true] %s509_s4 }
  0x22   : > { %s485_s21 = sshll.u32 %s1822_s8, 4  ;;  %s1823_s27 = smov [#allocation16]   ;;  %s486_s21 = int_to_ptr.vmem [resolvable:$true] %s485_s21 }
  0x23   : > { %1449 = dma.hbm_to_vmem [thread:$0]  (!%p1934_p5), %s484_s29, 16, %s486_s21, [#allocation12]  }
  0x24   : > { %s511_s28 = sshll.u32 %s1823_s27, 4  ;;  %534 = sbr.rel (%p1923_p3) target bundleno = 1883 (0x75b), region = 80  ;;  %s512_s28 = int_to_ptr.vmem [resolvable:$true] %s511_s28 }
  0x25   : > { %1455 = dma.hbm_to_vmem [thread:$0]  (!%p1934_p5), %s510_s4, 16, %s512_s28, [#allocation15]  }
  0x29   : > { %1790 = dma.done.wait (%p1456_p2), [#allocation4], 128  }
  0x2a   : > { %1792 = vsyncadd (%p1456_p2), [#allocation4], 4294967168 }
  0x2b   : > { %1794 = dma.done.wait (%p1456_p2), [#allocation6], 144  }
  0x2c   : > { %1796 = vsyncadd (%p1456_p2), [#allocation6], 4294967152 }
  0x2d   : > { %1798 = dma.done.wait (%p1456_p2), [#allocation9], 272  }
  0x2e   : > { %1800 = vsyncadd (%p1456_p2), [#allocation9], 4294967024 }
  0x2f   : > { %1802 = dma.done.wait (%p1456_p2), [#allocation12], 272  }
  0x30   : > { %1804 = vsyncadd (%p1456_p2), [#allocation12], 4294967024 }
  0x31   : > { %1806 = dma.done.wait (%p1456_p2), [#allocation15], 272  }
  0x32   : > { %1808 = vsyncadd (%p1456_p2), [#allocation15], 4294967024  ;;  %p621_p6 = scmp.lt.s32.totalorder %s1918_s23, 1  ;;  %vm633_vm0 = vcmask 261120   ;;  %v1301_v19 = vld [vmem:[%s2105_s2 + $0x18] sm:$0xf] }
  0x33   : > { %v1370_v20 = vld [vmem:[%s2105_s2 + $0x20] sm:$0xf0]  ;;  %v1369_v21 = vld [vmem:[%s2105_s2 + $0x1c] sm:$0xf]  ;;  %v1303_v23 = vld [vmem:[%s2105_s2 + $0x24] sm:$0xf0] }
  0x34   : > { %s2128_s23 = smov (!%p621_p6, %s1918_s23), 1  ;;  %v1302_v22 = vor.u32 %v1370_v20, %v1301_v19  ;;  %v1309_v24 = vld [vmem:[%s2105_s2 + $0x20] sm:$0xf]  ;;  %v1371_v25 = vld [vmem:[%s2105_s2 + $0x28] sm:$0xf0]  ;;  %v1306_v26 = vor.u32 %v1369_v21, %v1303_v23  ;;  %s1824_s21 = smov 64  }
  0x35   : > { %s1285_s24 = sshll.u32 %s2128_s23, 3  ;;  %v1310_v27 = vor.u32 %v1371_v25, %v1309_v24  ;;  %v1289_v28 = vld [vmem:[%s2105_s2] sm:$0xf]  ;;  %v1367_v29 = vld [vmem:[%s2105_s2 + $0x8] sm:$0xf0]  ;;  %vm812_vm4 = vcmask 1043456  }
  0x36   : > { %s624_s19 = scalar_lea.vmem %s2103_s0, %s1285_s24  ;;  %710 = vmatpush.bf16.msra.mxu0 %v1302_v22  ;;  %723 = vmatpush.bf16.msra.mxu1 %v1306_v26  ;;  %v1366_v30 = vld [vmem:[%s2105_s2 + $0x4] sm:$0xf]  ;;  %v1290_v31 = vor.u32 %v1367_v29, %v1289_v28  ;;  %v1291_v32 = vld [vmem:[%s2105_s2 + $0xc] sm:$0xf0]  ;;  %v1297_v33 = vld [vmem:[%s2105_s2 + $0x8] sm:$0xf] }
  0x37   : > { %v630_v1 = vld [vmem:[%s624_s19] sm:$0xff]  ;;  %736 = vmatpush.bf16.msra.mxu2 %v1310_v27  ;;  %v1368_v34 = vld [vmem:[%s2105_s2 + $0x10] sm:$0xf0]  ;;  %v1294_v35 = vor.u32 %v1366_v30, %v1291_v32  ;;  %v744_v37 = vld [vmem:[#allocation5] sm:$0xff]  ;;  %s1825_s18 = smov 96   ;;  %vm796_vm5 = vcmask 64512   ;;  %s628_s19 = scalar_lea.vmem %s2118_s15, %s1285_s24 }
  0x38   : > { %v632_v2 = vmul.f32 %v630_v1, %v630_v1  ;;  %v1298_v36 = vor.u32 %v1368_v34, %v1297_v33  ;;  %v2049_v38 = vld [vmem:[%s2104_s1] sm:$0xff] }
  0x39   : > { %v743_v54 = vld [vmem:[#allocation3] sm:$0xff] }
  0x3a   : > { %v634_v3 = vsel %vm633_vm0, %v632_v2, 0.0  ;;  %711 = vmatpush.bf16.msra.mxu0 %v1290_v31  ;;  %724 = vmatpush.bf16.msra.mxu1 %v1294_v35 }
  0x3b   : > { %635 = vadd.xlane.f32.xlu0 %v634_v3  ;;  %737 = vmatpush.bf16.msra.mxu2 %v1298_v36  ;;  %v1373_v36 = vld [vmem:[%s2109_s6 + $0x8] sm:$0xff] }
  0x4f   : > { %747 = vrot.lane.b32.xlu0 %v744_v37, %s1824_s21 }
  0xae   : > { %v636_v4 = vpop.xlane.xlu0 %635 }
  0xaf   : > { %v637_v5 = vrot.slane %v636_v4, 4 }
  0xb1   : > { %v638_v6 = vadd.f32 %v637_v5, %v636_v4 }
  0xb3   : > { %v639_v7 = vrot.slane %v638_v6, 2 }
  0xb5   : > { %v640_v8 = vadd.f32 %v639_v7, %v638_v6 }
  0xb7   : > { %v641_v9 = vrot.slane %v640_v8, 1 }
  0xb9   : > { %v642_v10 = vadd.f32 %v641_v9, %v640_v8  ;;  %v766_v8 = vld [vmem:[%s2108_s5] sm:$0xff] }
  0xbb   : > { %1382 = vpush %v642_v10 }
  0xc1   : > { %v748_v43 = vpop.permute.xlu0 %747 }
  0xec   : > { %s1383_s26 = spop %1382 }
  0xed   : > { %s644_s10 = smul.f32 0.00390625, %s1383_s26 }
  0xef   : > { %v645_v11 = vstv %s644_s10 }
  0xf0   : > { %1499 = vrsqrt.f32 %v645_v11  ;;  %vm652_vm2 = vweird.f32 %v645_v11 }
  0xf6   : > { %v1500_v12 = vpop.eup %1499 }
  0xf7   : > { %v647_v13 = vmul.f32 %v1500_v12, %v645_v11  ;;  %vm653_vm1 = vweird.f32 %v1500_v12 }
  0xf8   : > { %vm654_vm3 = vmor %vm652_vm2, %vm653_vm1 }
  0xf9   : > { %v648_v14 = vmul.f32 %v1500_v12, %v647_v13 }
  0xfb   : > { %v649_v15 = vmul.f32 0.5, %v648_v14 }
  0xfd   : > { %v650_v16 = vsub.f32 1.5, %v649_v15 }
  0xff   : > { %v651_v17 = vmul.f32 %v1500_v12, %v650_v16 }
 0x101   : > { %v655_v18 = vsel %vm654_vm3, %v1500_v12, %v651_v17 }
 0x102   : > { %1384 = vpush %v655_v18 }
 0x133   : > { %s1385_s27 = spop %1384 }
 0x134   : > { %v657_v39 = vstv %s1385_s27 }
 0x135   : > { %v658_v40 = vmul.f32 %v657_v39, %v630_v1 }
 0x137   : > { %v2052_v41 = vmul.f32 %v658_v40, %v2049_v38 }
 0x139   : > { %v660_v42 = vpack.c.bf16 %v2052_v41, %v2052_v41 }
 0x13b   : > { %1311 = vmatmul.msk.bf16.vlgmr.msra.gmra.mxu0 %vm633_vm0, %v660_v42  ;;  %1312 = vmatmul.msk.bf16.vlgmr.msra.gmra.mxu1 %vm633_vm0, %v660_v42 }
 0x13c   : > { %1313 = vmatmul.msk.bf16.vlgmr.msra.gmra.mxu2 %vm633_vm0, %v660_v42 }
 0x1b8   : > { %v713_v44 = vpop.f32.mrf.mxu0  ;;  %v726_v45 = vpop.f32.mrf.mxu1 }
 0x1b9   : > { %v757_v46 = vmul.f32 %v748_v43, %v726_v45  ;;  %v750_v51 = vmul.f32 %v748_v43, %v713_v44  ;;  %v756_v55 = vmul.f32 %v743_v54, %v726_v45  ;;  %v745_v61 = vmul.f32 %v743_v54, %v713_v44  ;;  %v1372_v43 = vld [vmem:[%s2109_s6] sm:$0xff]  ;;  %v1375_v44 = vld [vmem:[%s2109_s6 + $0x18] sm:$0xff] }
 0x1bb   : > { %759 = vrot.lane.b32.xlu1 %v757_v46, %s1824_s21 }
 0x1bf   : > { %v739_v47 = vpop.f32.mrf.mxu2 }
 0x1c0   : > { %v765_v48 = vpack.c.bf16 %v739_v47, %v739_v47  ;;  %v715_v49 = vpop.f32.mrf.mxu0  ;;  %v728_v50 = vpop.f32.mrf.mxu1 }
 0x1c2   : > { %v814_v52 = vsel %vm812_vm4, %v765_v48, 0  ;;  %v874_v13 = vunpack.c.l.b16 %v765_v48  ;;  %v1374_v48 = vld [vmem:[%s2109_s6 + $0x10] sm:$0xff] }
 0x1c3   : > { %823 = vmatpush.bf16.msrb.mxu0 %v814_v52  ;;  %752 = vrot.lane.b32.xlu1 %v750_v51, %s1824_s21 }
 0x1c4   : > { %v875_v14 = vpack.c.b16 %v874_v13, %v874_v13  ;;  %v1376_v13 = vld [vmem:[#allocation8] sm:$0xff] }
 0x1c7   : > { %v741_v53 = vpop.f32.mrf.mxu2  ;;  %947 = vmatpush.bf16.msra.mxu0 %v1373_v36 }
 0x1cb   : > { %948 = vmatpush.bf16.msra.mxu0 %v1372_v43 }
 0x22d   : > { %v760_v56 = vpop.permute.xlu1 %759 }
 0x22e   : > { %v762_v57 = vadd.f32 %v760_v56, %v756_v55  ;;  %v1495_v56 = vld [vmem:[#allocation7] ss:$0 sm:$0xff] }
 0x230   : > { %v764_v58 = vpack.c.bf16 %v762_v57, %v762_v57 }
 0x232   : > { %v779_v59 = vsel %vm633_vm0, %v764_v58, 0  ;;  %v836_v60 = vunpack.c.l.b16 %v764_v58 }
 0x233   : > { %788 = vmatpush.bf16.xpose.msra.mxu3 %v779_v59 }
 0x234   : > { %v837_v62 = vpack.c.b16 %v836_v60, %v836_v60 }
 0x235   : > { %v753_v63 = vpop.permute.xlu1 %752 }
 0x236   : > { %v755_v0 = vadd.f32 %v753_v63, %v745_v61  ;;  %838 = vrot.lane.b32.xlu2 %v837_v62, %s1825_s18 }
 0x238   : > { %v763_v1 = vpack.c.bf16 %v755_v0, %v755_v0 }
 0x23a   : > { %v831_v2 = vunpack.c.l.b16 %v763_v1  ;;  %1314 = vmatmul.msk.bf16.vlgmr.msra.gmra.mxu3 %vm633_vm0, %v763_v1 }
 0x23b   : > { %919 = vmatpush.bf16.msrb.mxu3 %v1375_v44 }
 0x23c   : > { %v832_v3 = vpack.c.b16 %v831_v2, %v831_v2 }
 0x23e   : > { %833 = vrot.lane.b32.xlu2 %v832_v3, %s1825_s18 }
 0x23f   : > { %920 = vmatpush.bf16.msrb.mxu3 %v1374_v48 }
 0x290   : > { %v839_v4 = vpop.permute.xlu2 %838 }
 0x291   : > { %v844_v5 = vsel %vm633_vm0, %v839_v4, 0 }
 0x292   : > { %853 = vmatpush.bf16.xpose.msrb.mxu1 %v844_v5 }
 0x298   : > { %v834_v6 = vpop.permute.xlu2 %833 }
 0x299   : > { %1316 = vmatmul.msk.bf16.vlgmr.msrb.gmra.mxu1 %vm633_vm0, %v834_v6 }
 0x2bd   : > { %v790_v7 = vpop.f32.mrf.mxu3 }
 0x2be   : > { %v794_v9 = vmul.f32 0.17677669, %v790_v7 }
 0x2c0   : > { %v795_v10 = vadd.f32 %v794_v9, %v766_v8 }
 0x2c2   : > { %v797_v11 = vsel %vm796_vm5, %v795_v10, -inf }
 0x2c3   : > { %798 = vmax.xlane.f32.xlu2 %v797_v11 }
 0x2c5   : > { %v792_v12 = vpop.f32.mrf.mxu3 }
 0x2c6   : > { %v1377_v12 = vld [vmem:[#allocation8 + $0x8] sm:$0xff] }
 0x2c7   : > { %1017 = vmatpush.bf16.msra.mxu1 %v1377_v12 }
 0x2cb   : > { %1018 = vmatpush.bf16.msra.mxu1 %v1376_v13 }
 0x2db   : > { %876 = vrot.lane.b32.xlu2 %v875_v14, %s1825_s18  ;;  %v1379_v14 = vld [vmem:[#allocation11 + $0x8] sm:$0xff] }
 0x316   : > { %v855_v15 = vpop.f32.mrf.mxu1 }
 0x317   : > { %v859_v16 = vmul.f32 0.17677669, %v855_v15  ;;  %v1381_v15 = vld [vmem:[#allocation14 + $0x8] sm:$0xff] }
 0x318   : > { %1087 = vmatpush.bf16.msra.mxu3 %v1381_v15 }
 0x319   : > { %v860_v17 = vadd.f32 %v859_v16, %v766_v8 }
 0x31b   : > { %v861_v18 = vsel %vm796_vm5, %v860_v17, -inf }
 0x31c   : > { %862 = vmax.xlane.f32.xlu1 %v861_v18 }
 0x31e   : > { %v857_v19 = vpop.f32.mrf.mxu1 }
 0x336   : > { %v799_v20 = vpop.xlane.xlu2 %798 }
 0x337   : > { %v800_v21 = vsub.f32 %v795_v10, %v799_v20  ;;  %v1378_v20 = vld [vmem:[#allocation11] sm:$0xff] }
 0x339   : > { %v801_v22 = vmul.f32 1.442695, %v800_v21  ;;  %v1380_v21 = vld [vmem:[#allocation14] sm:$0xff] }
 0x33a   : > { %1088 = vmatpush.bf16.msra.mxu3 %v1380_v21 }
 0x33b   : > { %1501 = vpow2.f32 %v801_v22  ;;  %v1094_v22 = vld [vmem:[#allocation2] sm:$0x1] }
 0x33e   : > { %v877_v23 = vpop.permute.xlu2 %876 }
 0x33f   : > { %v882_v24 = vsel %vm812_vm4, %v877_v23, 0  ;;  %v1496_v23 = vld [vmem:[#allocation10] ss:$0 sm:$0xff] }
 0x340   : > { %891 = vmatpush.bf16.msrb.mxu2 %v882_v24 }
 0x341   : > { %v1502_v25 = vpop.eup %1501 }
 0x342   : > { %v803_v26 = vsel %vm796_vm5, %v1502_v25, 0.0 }
 0x343   : > { %804 = vadd.xlane.f32.xlu1 %v803_v26 }
 0x344   : > { %1054 = vmatpush.bf16.msra.mxu2 %v1379_v14 }
 0x348   : > { %1055 = vmatpush.bf16.msra.mxu2 %v1378_v20 }
 0x38f   : > { %v863_v27 = vpop.xlane.xlu1 %862 }
 0x390   : > { %v864_v28 = vsub.f32 %v860_v17, %v863_v27 }
 0x392   : > { %v865_v29 = vmul.f32 1.442695, %v864_v28  ;;  %v1497_v28 = vld [vmem:[#allocation13] ss:$0 sm:$0xff] }
 0x394   : > { %1503 = vpow2.f32 %v865_v29 }
 0x39a   : > { %v1504_v30 = vpop.eup %1503 }
 0x39b   : > { %v867_v31 = vsel %vm796_vm5, %v1504_v30, 0.0 }
 0x39c   : > { %868 = vadd.xlane.f32.xlu0 %v867_v31 }
 0x3b6   : > { %v805_v32 = vpop.xlane.xlu1 %804 }
 0x3b7   : > { %1505 = vrcp.f32 %v805_v32 }
 0x3bd   : > { %v1506_v33 = vpop.eup %1505 }
 0x3be   : > { %v807_v34 = vmul.f32 %v1506_v33, %v1502_v25 }
 0x3c0   : > { %v808_v35 = vpack.c.bf16 %v807_v34, %v807_v34 }
 0x3c2   : > { %1315 = vmatmul.msk.bf16.vlgmr.msrb.gmra.mxu0 %vm796_vm5, %v808_v35 }
 0x40f   : > { %v869_v37 = vpop.xlane.xlu0 %868 }
 0x410   : > { %1507 = vrcp.f32 %v869_v37 }
 0x416   : > { %v1508_v39 = vpop.eup %1507 }
 0x417   : > { %v871_v40 = vmul.f32 %v1508_v39, %v1504_v30 }
 0x419   : > { %v872_v42 = vpack.c.bf16 %v871_v40, %v871_v40 }
 0x41b   : > { %1317 = vmatmul.msk.bf16.vlgmr.msrb.gmra.mxu2 %vm796_vm5, %v872_v42 }
 0x43f   : > { %v825_v45 = vpop.f32.mrf.mxu0 }
 0x440   : > { %v829_v46 = vpack.c.bf16 %v825_v45, %v825_v45 }
 0x442   : > { %1335 = vmatmul.msk.bf16.vlgmr.msra.gmra.mxu0 %vm633_vm0, %v829_v46  ;;  %v1498_v46 = vld [vmem:[#allocation16] ss:$0 sm:$0xff] }
 0x447   : > { %v827_v47 = vpop.f32.mrf.mxu0 }
 0x49e   : > { %v893_v49 = vpop.f32.mrf.mxu2 }
 0x49f   : > { %v897_v50 = vpack.c.bf16 %v893_v49, %v893_v49 }
 0x4a1   : > { %1326 = vmatmul.msk.bf16.vlgmr.msrb.gmra.mxu3 %vm633_vm0, %v897_v50 }
 0x4a6   : > { %v895_v51 = vpop.f32.mrf.mxu2 }
 0x4bf   : > { %v950_v52 = vpop.f32.mrf.mxu0 }
 0x4c7   : > { %v952_v53 = vpop.f32.mrf.mxu0 }
 0x524   : > { %v922_v54 = vpop.f32.mrf.mxu3 }
 0x525   : > { %v951_v55 = vadd.f32 %v950_v52, %v922_v54 }
 0x527   : > { %v954_v57 = vadd.f32 %v951_v55, %v2052_v41 }
 0x529   : > { %v959_v58 = vadd.f32 %v1495_v56, %v954_v57 }
 0x52b   : > { %v960_v59 = vmul.f32 %v959_v58, %v959_v58 }
 0x52c   : > { %v924_v60 = vpop.f32.mrf.mxu3 }
 0x52d   : > { %v961_v61 = vsel %vm633_vm0, %v960_v59, 0.0 }
 0x52e   : > { %962 = vadd.xlane.f32.xlu1 %v961_v61 }
 0x5a1   : > { %v963_v62 = vpop.xlane.xlu1 %962 }
 0x5a2   : > { %v964_v63 = vrot.slane %v963_v62, 4 }
 0x5a4   : > { %v965_v0 = vadd.f32 %v964_v63, %v963_v62 }
 0x5a6   : > { %v966_v1 = vrot.slane %v965_v0, 2 }
 0x5a8   : > { %v967_v2 = vadd.f32 %v966_v1, %v965_v0 }
 0x5aa   : > { %v968_v3 = vrot.slane %v967_v2, 1 }
 0x5ac   : > { %v969_v4 = vadd.f32 %v968_v3, %v967_v2 }
 0x5ae   : > { %1386 = vpush %v969_v4 }
 0x5df   : > { %s1387_s8 = spop %1386 }
 0x5e0   : > { %s971_s21 = smul.f32 0.00390625, %s1387_s8 }
 0x5e2   : > { %v972_v5 = vstv %s971_s21 }
 0x5e3   : > { %1509 = vrsqrt.f32 %v972_v5  ;;  %vm979_vm7 = vweird.f32 %v972_v5 }
 0x5e9   : > { %v1510_v6 = vpop.eup %1509 }
 0x5ea   : > { %v974_v41 = vmul.f32 %v1510_v6, %v972_v5  ;;  %vm980_vm6 = vweird.f32 %v1510_v6 }
 0x5eb   : > { %vm981_vm8 = vmor %vm979_vm7, %vm980_vm6 }
 0x5ec   : > { %v975_v7 = vmul.f32 %v1510_v6, %v974_v41 }
 0x5ee   : > { %v976_v8 = vmul.f32 0.5, %v975_v7 }
 0x5f0   : > { %v977_v9 = vsub.f32 1.5, %v976_v8 }
 0x5f2   : > { %v978_v10 = vmul.f32 %v1510_v6, %v977_v9 }
 0x5f4   : > { %v982_v11 = vsel %vm981_vm8, %v1510_v6, %v978_v10 }
 0x5f5   : > { %1388 = vpush %v982_v11 }
 0x5f6   : > { %1390 = vpush %v1094_v22 }
 0x626   : > { %s1389_s27 = spop %1388 }
 0x627   : > { %v984_v16 = vstv %s1389_s27  ;;  %s1391_s28 = spop %1390 }
 0x628   : > { %v985_v17 = vmul.f32 %v984_v16, %v959_v58  ;;  %v1096_v30 = vstv %s1391_s28 }
 0x62a   : > { %v986_v18 = vmul.f32 %v985_v17, %v2049_v38 }
 0x62c   : > { %v987_v19 = vpack.c.bf16 %v986_v18, %v986_v18 }
 0x62e   : > { %1344 = vmatmul.msk.bf16.vlgmr.msra.gmra.mxu1 %vm633_vm0, %v987_v19 }
 0x6ab   : > { %v1020_v24 = vpop.f32.mrf.mxu1 }
 0x6ac   : > { %v1021_v25 = vadd.f32 %v1496_v23, %v1020_v24 }
 0x6ae   : > { %v1024_v26 = vpack.c.bf16 %v1021_v25, %v1021_v25 }
 0x6b0   : > { %1353 = vmatmul.msk.bf16.vlgmr.msra.gmra.mxu2 %vm633_vm0, %v1024_v26  ;;  %1362 = vmatmul.msk.bf16.vlgmr.msra.gmra.mxu3 %vm633_vm0, %v1024_v26 }
 0x6b3   : > { %v1022_v27 = vpop.f32.mrf.mxu1 }
 0x733   : > { %v1057_v38 = vpop.f32.mrf.mxu2  ;;  %v1090_v29 = vpop.f32.mrf.mxu3 }
 0x734   : > { %v1058_v31 = vadd.f32 %v1497_v28, %v1057_v38  ;;  %v1091_v51 = vadd.f32 %v1498_v46, %v1090_v29 }
 0x736   : > { %v1097_v32 = vmul.f32 %v1096_v30, %v1058_v31 }
 0x738   : > { %v1363_v33 = vmul.f32 -1.442695, %v1097_v32 }
 0x73a   : > { %1511 = vpow2.f32 %v1363_v33 }
 0x73b   : > { %v1059_v34 = vpop.f32.mrf.mxu2  ;;  %v1092_v35 = vpop.f32.mrf.mxu3 }
 0x740   : > { %v1512_v36 = vpop.eup %1511 }
 0x741   : > { %v1101_v37 = vadd.f32 1.0, %v1512_v36 }
 0x743   : > { %1513 = vrcp.f32 %v1101_v37  ;;  %v1113_v43 = vand.u32 2147483648, %v1101_v37  ;;  %v1111_v45 = vand.u32 2147483647, %v1101_v37  ;;  %vm1107_vm10 = vweird.f32 %v1101_v37 }
 0x745   : > { %v1114_v48 = vor.u32 1.1754944e-38, %v1113_v43  ;;  %vm1112_vm12 = vcmp.eq.f32.partialorder %v1111_v45, 8.507059e+37 }
 0x749   : > { %v1514_v39 = vpop.eup %1513 }
 0x74a   : > { %v1103_v40 = vmul.f32 %v1514_v39, %v1101_v37  ;;  %vm1108_vm9 = vweird.f32 %v1514_v39 }
 0x74b   : > { %vm1109_vm11 = vmor %vm1107_vm10, %vm1108_vm9 }
 0x74c   : > { %v1104_v42 = vsub.f32 1.0, %v1103_v40 }
 0x74e   : > { %v1105_v44 = vmul.f32 %v1514_v39, %v1104_v42 }
 0x750   : > { %v1106_v47 = vadd.f32 %v1514_v39, %v1105_v44 }
 0x752   : > { %v1110_v49 = vsel %vm1109_vm11, %v1514_v39, %v1106_v47 }
 0x753   : > { %v1115_v50 = vsel %vm1112_vm12, %v1114_v48, %v1110_v49 }
 0x754   : > { %v1117_v52 = vmul.f32 %v1115_v50, %v1058_v31 }
 0x756   : > { %v1118_v53 = vmul.f32 %v1117_v52, %v1091_v51 }
 0x758   : > { %v1119_v54 = vadd.f32 %v1118_v53, %v986_v18 }
 0x75a   : > { %1120 = vst.msk [vmem:[%s628_s19] sm:$0xff] %vm633_vm0, %v1119_v54 }
 0x75b PF: > { %s32_s20 = sadd.s32 1, %s1811_s20  }
 0x75c   : > { %p29_p7 = scmp.ge.s32.totalorder %s32_s20, 4  }
 0x75e   :  { %31 = sbr.rel (!%p29_p7) target bundleno = 9 (0x9), region = 147 }
 0x763   :  { %1140 = vsyncpa [#allocation4], 1 }
 0x764   :  { %1142 = vsyncpa [#allocation4 + $0x1], 1 }
 0x765   :  { %1143 = vsyncpa [#allocation6], 1 }
 0x766   :  { %1144 = vsyncpa [#allocation9], 1 }
 0x767   :  { %1145 = vsyncpa [#allocation12], 1 }
 0x768   :  { %1146 = vsyncpa [#allocation15], 1 }

</bundles_post_ra>
